<compile_context>
chip_gen: v6e
topology: v6e:2x2x1
jax: 0.10.0
libtpu: 0.0.40
codegen_flags: <defaults>
</compile_context>

<pallas_src>
import functools
import math

import jax
import jax.numpy as jnp
from jax.experimental import pallas as pl
from jax.experimental.pallas import tpu as pltpu


_VMEM_LIMIT = 32 * 1024 * 1024


def _round_up(v, m):
    return ((v + m - 1) // m) * m


# ----------------------------------------------------------------------------
# MLP parameters (torch_geometric.nn.MLP semantics, eval mode, plain_last=True)
# BatchNorm (running_mean=0, running_var=1, gamma=1, beta=0, eps=1e-5) is
# folded into W/b here, once, and the weights are padded + cast to bf16 once.
# ----------------------------------------------------------------------------
def make_mlp(key, channels, batch_norm=True):
    eps = 1e-5
    layers = []
    n_layers = len(channels) - 1
    kin_p = channels[0]                      # first layer keeps unpadded input dim
    for i in range(n_layers):
        key, kw, kb = jax.random.split(key, 3)
        cin, cout = channels[i], channels[i + 1]
        w = jax.random.normal(kw, (cin, cout), jnp.float32) / jnp.sqrt(float(cin))
        b = 0.01 * jax.random.normal(kb, (cout,), jnp.float32)
        last = (i == n_layers - 1)
        scale = (1.0 / math.sqrt(1.0 + eps)) if ((not last) and batch_norm) else 1.0
        w = w * scale                        # fold BN (mean=0, beta=0 -> shift=0)
        b = b * scale
        cout_p = _round_up(cout, 128)
        wp = (jnp.zeros((kin_p, cout_p), jnp.float32)
              .at[:cin, :cout].set(w).astype(jnp.bfloat16))
        bp = jnp.zeros((1, cout_p), jnp.float32).at[0, :cout].set(b)
        layers.append((wp, bp, not last))    # (weight bf16, bias f32, relu?)
        kin_p = cout_p
    return {"layers": layers, "out_dim": channels[-1]}, key


# ----------------------------------------------------------------------------
# Fused multi-layer MLP kernel:  h -> relu(h @ W1 + b1) -> ... -> out
# One pallas_call per MLP; weights resident via constant index_maps.
# ----------------------------------------------------------------------------
def _mlp_kernel(nl, relu_flags, *refs):
    x_ref = refs[0]
    o_ref = refs[-1]
    h = x_ref[...]
    for li in range(nl):
        w_ref = refs[1 + 2 * li]
        b_ref = refs[2 + 2 * li]
        y = jnp.dot(h.astype(jnp.bfloat16), w_ref[...],
                    preferred_element_type=jnp.float32)
        y = y + b_ref[...]
        if relu_flags[li]:
            y = jnp.maximum(y, 0.0)
        h = y
    o_ref[...] = h


def mlp_apply(mlp, x, tm=512):
    layers = mlp["layers"]
    out_dim = mlp["out_dim"]
    x = x.astype(jnp.float32)
    M, K = x.shape
    assert K == layers[0][0].shape[0], (K, layers[0][0].shape)
    TM = min(tm, _round_up(M, 8))
    nl = len(layers)
    relu_flags = tuple(l[2] for l in layers)
    n_out = layers[-1][0].shape[1]

    in_specs = [pl.BlockSpec((TM, K), lambda i: (i, 0))]
    operands = [x]
    flops = 0
    bytes_accessed = x.size * 4 + M * n_out * 4
    for (wp, bp, _) in layers:
        kin, kout = wp.shape
        in_specs.append(pl.BlockSpec((kin, kout), lambda i: (0, 0)))
        in_specs.append(pl.BlockSpec((1, kout), lambda i: (0, 0)))
        operands += [wp, bp]
        flops += 2 * M * kin * kout
        bytes_accessed += wp.size * 2 + bp.size * 4

    out = pl.pallas_call(
        functools.partial(_mlp_kernel, nl, relu_flags),
        out_shape=jax.ShapeDtypeStruct((M, n_out), jnp.float32),
        grid_spec=pltpu.PrefetchScalarGridSpec(
            num_scalar_prefetch=0,
            grid=(pl.cdiv(M, TM),),
            in_specs=in_specs,
            out_specs=pl.BlockSpec((TM, n_out), lambda i: (i, 0)),
        ),
        compiler_params=pltpu.CompilerParams(
            dimension_semantics=("parallel",),
            vmem_limit_bytes=_VMEM_LIMIT),
        cost_estimate=pl.CostEstimate(
            flops=flops, transcendentals=0, bytes_accessed=bytes_accessed),
    )(*operands)
    return out[:, :out_dim]
    # TODO(synk): dropout=0.5 in the head MLP is eval-mode identity here.


# ----------------------------------------------------------------------------
# Fused SA message MLP + radius-mask + max aggregation kernel.
# Rows are grouped per centre (k_pad neighbour rows per centre); each grid step
# processes `tc` centres, runs all MLP layers in VMEM, and reduces to (tc, C).
# ----------------------------------------------------------------------------
def _sa_kernel(nl, relu_flags, tc, k_pad, *refs):
    f_ref, m_ref = refs[0], refs[1]
    o_ref = refs[-1]
    h = f_ref[...]
    for li in range(nl):
        w_ref = refs[2 + 2 * li]
        b_ref = refs[3 + 2 * li]
        y = jnp.dot(h.astype(jnp.bfloat16), w_ref[...],
                    preferred_element_type=jnp.float32)
        y = y + b_ref[...]
        if relu_flags[li]:
            y = jnp.maximum(y, 0.0)
        h = y
    hm = jnp.where(m_ref[...] > 0.5, h, jnp.float32(-1e30))
    for c in range(tc):                               # masked max per centre
        seg = hm[c * k_pad:(c + 1) * k_pad, :]
        red = jnp.max(seg, axis=0, keepdims=True)
        red = jnp.where(red > jnp.float32(-1e29), red, jnp.float32(0.0))
        o_ref[pl.ds(c, 1), :] = red


def sa_conv_apply(mlp, feats_flat, mask_flat, S, k_pad):
    layers = mlp["layers"]
    out_dim = mlp["out_dim"]
    F = feats_flat.shape[1]
    nl = len(layers)
    relu_flags = tuple(l[2] for l in layers)
    n_out = layers[-1][0].shape[1]

    tc = max(8, (512 // k_pad) // 8 * 8)              # centres per tile (mult of 8)
    TM = tc * k_pad                                   # neighbour rows per tile

    in_specs = [pl.BlockSpec((TM, F), lambda i: (i, 0)),
                pl.BlockSpec((TM, 1), lambda i: (i, 0))]
    operands = [feats_flat, mask_flat]
    rows = feats_flat.shape[0]
    flops = 0
    bytes_accessed = feats_flat.size * 4 + mask_flat.size * 4 + S * n_out * 4
    for (wp, bp, _) in layers:
        kin, kout = wp.shape
        in_specs.append(pl.BlockSpec((kin, kout), lambda i: (0, 0)))
        in_specs.append(pl.BlockSpec((1, kout), lambda i: (0, 0)))
        operands += [wp, bp]
        flops += 2 * rows * kin * kout
        bytes_accessed += wp.size * 2 + bp.size * 4

    out = pl.pallas_call(
        functools.partial(_sa_kernel, nl, relu_flags, tc, k_pad),
        out_shape=jax.ShapeDtypeStruct((S, n_out), jnp.float32),
        grid_spec=pltpu.PrefetchScalarGridSpec(
            num_scalar_prefetch=0,
            grid=(pl.cdiv(S, tc),),
            in_specs=in_specs,
            out_specs=pl.BlockSpec((tc, n_out), lambda i: (i, 0)),
        ),
        compiler_params=pltpu.CompilerParams(
            dimension_semantics=("parallel",),
            vmem_limit_bytes=_VMEM_LIMIT),
        cost_estimate=pl.CostEstimate(
            flops=flops, transcendentals=0, bytes_accessed=bytes_accessed),
    )(*operands)
    return out[:, :out_dim]


# ----------------------------------------------------------------------------
# Graph glue (plain JAX): FPS, neighbour selection, global pool, kNN interp.
# ----------------------------------------------------------------------------
def fps_indices(pos, B, ratio):
    """Farthest point sampling per graph (deterministic start at local idx 0)."""
    N = pos.shape[0]
    n_per = N // B
    n_sample = int(math.ceil(ratio * n_per))
    pos_b = pos.reshape(B, n_per, 3)

    def body(i, state):
        idx, min_d2, last = state
        last_pos = pos_b[jnp.arange(B), last]                       # (B, 3)
        d2 = jnp.sum((pos_b - last_pos[:, None, :]) ** 2, axis=-1)  # (B, n_per)
        min_d2 = jnp.minimum(min_d2, d2)
        nxt = jnp.argmax(min_d2, axis=-1).astype(jnp.int32)
        idx = idx.at[:, i].set(nxt)
        return idx, min_d2, nxt

    idx0 = jnp.zeros((B, n_sample), jnp.int32)
    start = jnp.zeros((B,), jnp.int32)
    min_d2 = jnp.full((B, n_per), jnp.inf, jnp.float32)
    idx, _, _ = jax.lax.fori_loop(1, n_sample, body, (idx0, min_d2, start))
    idx = idx + (jnp.arange(B, dtype=jnp.int32) * n_per)[:, None]
    return idx.reshape(-1)                                          # flat node indices


def sa_module(x, pos, batch, B, ratio, r, mlp):
    """SAModule: fps -> radius (capped at 64 nearest in-radius) -> PointNetConv(max)."""
    N = pos.shape[0]
    idx = fps_indices(pos, B, ratio)
    pos_c, batch_c = pos[idx], batch[idx]
    S = pos_c.shape[0]

    d2 = jnp.sum((pos_c[:, None, :] - pos[None, :, :]) ** 2, axis=-1)     # (S, N)
    in_r = (d2 <= float(r) ** 2) & (batch_c[:, None] == batch[None, :])
    d2m = jnp.where(in_r, d2, jnp.inf)

    # PyG radius(..., max_num_neighbors=64): we keep the 64 NEAREST in-radius
    # neighbours per centre (PyG keeps an arbitrary first-64).
    k_cap = min(64, N)
    _, nn_idx = jax.lax.top_k(-d2m, k_cap)                                # (S, k_cap)
    valid = jnp.take_along_axis(in_r, nn_idx, axis=1)
    k_pad = _round_up(k_cap, 8)
    if k_pad > k_cap:
        pad = k_pad - k_cap
        nn_idx = jnp.concatenate([nn_idx, jnp.zeros((S, pad), nn_idx.dtype)], axis=1)
        valid = jnp.concatenate([valid, jnp.zeros((S, pad), jnp.bool_)], axis=1)

    rel = pos[nn_idx] - pos_c[:, None, :]                                 # (S, k_pad, 3)
    if x is None:
        feats = rel
    else:
        feats = jnp.concatenate([x[nn_idx], rel], axis=-1)                # [x_j, pos_j - pos_i]
    F = feats.shape[-1]
    feats_flat = feats.reshape(S * k_pad, F)
    mask_flat = valid.astype(jnp.float32).reshape(S * k_pad, 1)

    out = sa_conv_apply(mlp, feats_flat, mask_flat, S, k_pad)
    return out, pos_c, batch_c


def global_sa_module(x, pos, batch, B, mlp):
    h = mlp_apply(mlp, jnp.concatenate([x, pos], axis=1))
    n_per = h.shape[0] // B
    pooled = jnp.max(h.reshape(B, n_per, -1), axis=1)                     # global_max_pool
    pos_out = jnp.zeros((B, 3), jnp.float32)
    batch_out = jnp.arange(B, dtype=jnp.int32)
    return pooled, pos_out, batch_out


def knn_interpolate(x, pos, pos_skip, batch, batch_skip, k):
    d2 = jnp.sum((pos_skip[:, None, :] - pos[None, :, :]) ** 2, axis=-1)  # (M, N)
    same = batch_skip[:, None] == batch[None, :]
    d2m = jnp.where(same, d2, jnp.inf)
    neg_d2, nn_idx = jax.lax.top_k(-d2m, k)                               # (M, k)
    nn_d2 = -neg_d2
    valid = jnp.take_along_axis(same, nn_idx, axis=1)
    w = 1.0 / jnp.clip(nn_d2, 1e-16, None)
    w = jnp.where(valid, w, 0.0)
    xg = x[nn_idx]                                                        # (M, k, C)
    num = jnp.sum(w[:, :, None] * xg, axis=1)
    den = jnp.clip(jnp.sum(w, axis=1, keepdims=True), 1e-16, None)
    return num / den


def fp_module(x, pos, batch, x_skip, pos_skip, batch_skip, k, mlp):
    h = knn_interpolate(x, pos, pos_skip, batch, batch_skip, k)
    if x_skip is not None:
        h = jnp.concatenate([h, x_skip], axis=1)
    h = mlp_apply(mlp, h)
    return h, pos_skip, batch_skip


# ----------------------------------------------------------------------------
# Net
# ----------------------------------------------------------------------------
def init_net_params(key, num_features):
    p = {}
    p["sa1"], key = make_mlp(key, [3 + num_features, 64, 64, 128])
    p["sa2"], key = make_mlp(key, [128 + 3, 128, 128, 256])
    p["sa3"], key = make_mlp(key, [256 + 3, 256, 512, 1024])
    p["fp3"], key = make_mlp(key, [1024 + 256, 256, 256])
    p["fp2"], key = make_mlp(key, [256 + 128, 256, 128])
    p["fp1"], key = make_mlp(key, [128 + num_features, 128, 128, 128])
    p["mlp"], key = make_mlp(key, [128, 128, 128, 1], batch_norm=False)
    return p


def net_forward(params, x, pos, batch, B):
    sa0 = (x, pos, batch)
    sa1 = sa_module(*sa0, B, 0.2, 2.0, params["sa1"])
    sa2 = sa_module(*sa1, B, 0.25, 8.0, params["sa2"])
    sa3 = global_sa_module(*sa2, B, params["sa3"])
    fp3 = fp_module(*sa3, *sa2, k=1, mlp=params["fp3"])
    fp2 = fp_module(*fp3, *sa1, k=3, mlp=params["fp2"])
    fp1 = fp_module(*fp2, *sa0, k=3, mlp=params["fp1"])
    out = mlp_apply(params["mlp"], fp1[0])
    return out


# ----------------------------------------------------------------------------
if __name__ == "__main__":
    key = jax.random.PRNGKey(0)
    num_features = 4
    B = 2                 # graphs in the batch
    n_per = 64            # points per graph
    N = B * n_per

    key, kx, kp = jax.random.split(key, 3)
    x = jax.random.normal(kx, (N, num_features), jnp.float32)
    pos = 4.0 * jax.random.uniform(kp, (N, 3), jnp.float32)
    batch = jnp.repeat(jnp.arange(B, dtype=jnp.int32), n_per)

    params = init_net_params(jax.random.PRNGKey(1), num_features)

    out = net_forward(params, x, pos, batch, B)
    out = jax.block_until_ready(out)

    assert out.shape == (N, 1), out.shape
    assert bool(jnp.all(jnp.isfinite(out)))
    print("KERNEL_OK")
</pallas_src>

<mosaic_0001>
module attributes {stable_mosaic.version = 11 : i64} {
  func.func @_sa_kernel(%arg0: i32, %arg1: memref<512x7xf32, #tpu.memory_space<vmem>>, %arg2: memref<512x1xf32, #tpu.memory_space<vmem>>, %arg3: memref<7x128xbf16, #tpu.memory_space<vmem>>, %arg4: memref<1x128xf32, #tpu.memory_space<vmem>>, %arg5: memref<128x128xbf16, #tpu.memory_space<vmem>>, %arg6: memref<1x128xf32, #tpu.memory_space<vmem>>, %arg7: memref<128x128xbf16, #tpu.memory_space<vmem>>, %arg8: memref<1x128xf32, #tpu.memory_space<vmem>>, %arg9: memref<8x128xf32, #tpu.memory_space<vmem>>) attributes {dimension_semantics = [#tpu.dimension_semantics<parallel>], iteration_bounds = array<i64: 4>, scalar_prefetch = 0 : i64, scratch_operands = 0 : i64, tpu.core_type = #tpu.core_type<tc>, window_params = [{transform_indices = @transform_0, window_bounds = array<i64: 512, 7>}, {transform_indices = @transform_1, window_bounds = array<i64: 512, 1>}, {pipeline_mode = #tpu.pipeline_mode<synchronous>, transform_indices = @transform_2, window_bounds = array<i64: 7, 128>}, {pipeline_mode = #tpu.pipeline_mode<synchronous>, transform_indices = @transform_3, window_bounds = array<i64: 1, 128>}, {pipeline_mode = #tpu.pipeline_mode<synchronous>, transform_indices = @transform_4, window_bounds = array<i64: 128, 128>}, {pipeline_mode = #tpu.pipeline_mode<synchronous>, transform_indices = @transform_5, window_bounds = array<i64: 1, 128>}, {pipeline_mode = #tpu.pipeline_mode<synchronous>, transform_indices = @transform_6, window_bounds = array<i64: 128, 128>}, {pipeline_mode = #tpu.pipeline_mode<synchronous>, transform_indices = @transform_7, window_bounds = array<i64: 1, 128>}, {transform_indices = @transform_8, window_bounds = array<i64: 8, 128>}]} {
    %c0 = arith.constant 0 : index
    %c0_0 = arith.constant 0 : index
    %0 = vector.load %arg1[%c0, %c0_0] : memref<512x7xf32, #tpu.memory_space<vmem>>, vector<512x7xf32>
    %1 = arith.truncf %0 : vector<512x7xf32> to vector<512x7xbf16>
    %c0_1 = arith.constant 0 : index
    %c0_2 = arith.constant 0 : index
    %2 = vector.load %arg3[%c0_1, %c0_2] : memref<7x128xbf16, #tpu.memory_space<vmem>>, vector<7x128xbf16>
    %cst = arith.constant dense<0.000000e+00> : vector<512x128xf32>
    %3 = tpu.matmul %1, %2, %cst {dimension_numbers = #tpu.dot_dimension_numbers<[1], [0], [0], [1], [0, 0, 1, 1], [], []>} : vector<512x7xbf16>, vector<7x128xbf16>, vector<512x128xf32> -> vector<512x128xf32>
    %c0_3 = arith.constant 0 : index
    %c0_4 = arith.constant 0 : index
    %4 = vector.load %arg4[%c0_3, %c0_4] : memref<1x128xf32, #tpu.memory_space<vmem>>, vector<1x128xf32>
    %5 = vector.broadcast %4 : vector<1x128xf32> to vector<512x128xf32>
    %6 = arith.addf %3, %5 : vector<512x128xf32>
    %cst_5 = arith.constant 0.000000e+00 : f32
    %7 = vector.broadcast %cst_5 : f32 to vector<512x128xf32>
    %8 = arith.maximumf %6, %7 : vector<512x128xf32>
    %9 = arith.truncf %8 : vector<512x128xf32> to vector<512x128xbf16>
    %c0_6 = arith.constant 0 : index
    %c0_7 = arith.constant 0 : index
    %10 = vector.load %arg5[%c0_6, %c0_7] : memref<128x128xbf16, #tpu.memory_space<vmem>>, vector<128x128xbf16>
    %cst_8 = arith.constant dense<0.000000e+00> : vector<512x128xf32>
    %11 = tpu.matmul %9, %10, %cst_8 {dimension_numbers = #tpu.dot_dimension_numbers<[1], [0], [0], [1], [0, 0, 1, 1], [], []>} : vector<512x128xbf16>, vector<128x128xbf16>, vector<512x128xf32> -> vector<512x128xf32>
    %c0_9 = arith.constant 0 : index
    %c0_10 = arith.constant 0 : index
    %12 = vector.load %arg6[%c0_9, %c0_10] : memref<1x128xf32, #tpu.memory_space<vmem>>, vector<1x128xf32>
    %13 = vector.broadcast %12 : vector<1x128xf32> to vector<512x128xf32>
    %14 = arith.addf %11, %13 : vector<512x128xf32>
    %cst_11 = arith.constant 0.000000e+00 : f32
    %15 = vector.broadcast %cst_11 : f32 to vector<512x128xf32>
    %16 = arith.maximumf %14, %15 : vector<512x128xf32>
    %17 = arith.truncf %16 : vector<512x128xf32> to vector<512x128xbf16>
    %c0_12 = arith.constant 0 : index
    %c0_13 = arith.constant 0 : index
    %18 = vector.load %arg7[%c0_12, %c0_13] : memref<128x128xbf16, #tpu.memory_space<vmem>>, vector<128x128xbf16>
    %cst_14 = arith.constant dense<0.000000e+00> : vector<512x128xf32>
    %19 = tpu.matmul %17, %18, %cst_14 {dimension_numbers = #tpu.dot_dimension_numbers<[1], [0], [0], [1], [0, 0, 1, 1], [], []>} : vector<512x128xbf16>, vector<128x128xbf16>, vector<512x128xf32> -> vector<512x128xf32>
    %c0_15 = arith.constant 0 : index
    %c0_16 = arith.constant 0 : index
    %20 = vector.load %arg8[%c0_15, %c0_16] : memref<1x128xf32, #tpu.memory_space<vmem>>, vector<1x128xf32>
    %21 = vector.broadcast %20 : vector<1x128xf32> to vector<512x128xf32>
    %22 = arith.addf %19, %21 : vector<512x128xf32>
    %c0_17 = arith.constant 0 : index
    %c0_18 = arith.constant 0 : index
    %23 = vector.load %arg2[%c0_17, %c0_18] : memref<512x1xf32, #tpu.memory_space<vmem>>, vector<512x1xf32>
    %cst_19 = arith.constant 5.000000e-01 : f32
    %24 = vector.broadcast %cst_19 : f32 to vector<512x1xf32>
    %25 = arith.cmpf ogt, %23, %24 : vector<512x1xf32>
    %cst_20 = arith.constant -1.000000e+30 : f32
    %26 = vector.shape_cast %25 : vector<512x1xi1> to vector<512x1xi1>
    %27 = vector.broadcast %26 : vector<512x1xi1> to vector<512x128xi1>
    %28 = vector.broadcast %cst_20 : f32 to vector<512x128xf32>
    %29 = arith.select %27, %22, %28 : vector<512x128xi1>, vector<512x128xf32>
    %30 = vector.extract_strided_slice %29 {offsets = [0, 0], sizes = [64, 128], strides = [1, 1]} : vector<512x128xf32> to vector<64x128xf32>
    %cst_21 = arith.constant dense<0xFF800000> : vector<128xf32>
    %31 = vector.multi_reduction <maximumf>, %30, %cst_21 [0] : vector<64x128xf32> to vector<128xf32>
    %32 = vector.shape_cast %31 : vector<128xf32> to vector<1x128xf32>
    %cst_22 = arith.constant -1.000000e+29 : f32
    %33 = vector.broadcast %cst_22 : f32 to vector<1x128xf32>
    %34 = arith.cmpf ogt, %32, %33 : vector<1x128xf32>
    %cst_23 = arith.constant 0.000000e+00 : f32
    %35 = vector.broadcast %cst_23 : f32 to vector<1x128xf32>
    %36 = arith.select %34, %32, %35 : vector<1x128xi1>, vector<1x128xf32>
    %c0_24 = arith.constant 0 : index
    %c0_25 = arith.constant 0 : index
    %37 = vector.load %arg9[%c0_24, %c0_25] : memref<8x128xf32, #tpu.memory_space<vmem>>, vector<1x128xf32>
    tpu.vector_store %arg9[%c0_24, %c0_25], %36 {strides = array<i32>} : memref<8x128xf32, #tpu.memory_space<vmem>>, vector<1x128xf32>,
    %38 = vector.extract_strided_slice %29 {offsets = [64, 0], sizes = [64, 128], strides = [1, 1]} : vector<512x128xf32> to vector<64x128xf32>
    %cst_26 = arith.constant dense<0xFF800000> : vector<128xf32>
    %39 = vector.multi_reduction <maximumf>, %38, %cst_26 [0] : vector<64x128xf32> to vector<128xf32>
    %40 = vector.shape_cast %39 : vector<128xf32> to vector<1x128xf32>
    %cst_27 = arith.constant -1.000000e+29 : f32
    %41 = vector.broadcast %cst_27 : f32 to vector<1x128xf32>
    %42 = arith.cmpf ogt, %40, %41 : vector<1x128xf32>
    %cst_28 = arith.constant 0.000000e+00 : f32
    %43 = vector.broadcast %cst_28 : f32 to vector<1x128xf32>
    %44 = arith.select %42, %40, %43 : vector<1x128xi1>, vector<1x128xf32>
    %c1 = arith.constant 1 : index
    %c0_29 = arith.constant 0 : index
    %45 = vector.load %arg9[%c1, %c0_29] : memref<8x128xf32, #tpu.memory_space<vmem>>, vector<1x128xf32>
    tpu.vector_store %arg9[%c1, %c0_29], %44 {strides = array<i32>} : memref<8x128xf32, #tpu.memory_space<vmem>>, vector<1x128xf32>,
    %46 = vector.extract_strided_slice %29 {offsets = [128, 0], sizes = [64, 128], strides = [1, 1]} : vector<512x128xf32> to vector<64x128xf32>
    %cst_30 = arith.constant dense<0xFF800000> : vector<128xf32>
    %47 = vector.multi_reduction <maximumf>, %46, %cst_30 [0] : vector<64x128xf32> to vector<128xf32>
    %48 = vector.shape_cast %47 : vector<128xf32> to vector<1x128xf32>
    %cst_31 = arith.constant -1.000000e+29 : f32
    %49 = vector.broadcast %cst_31 : f32 to vector<1x128xf32>
    %50 = arith.cmpf ogt, %48, %49 : vector<1x128xf32>
    %cst_32 = arith.constant 0.000000e+00 : f32
    %51 = vector.broadcast %cst_32 : f32 to vector<1x128xf32>
    %52 = arith.select %50, %48, %51 : vector<1x128xi1>, vector<1x128xf32>
    %c2 = arith.constant 2 : index
    %c0_33 = arith.constant 0 : index
    %53 = vector.load %arg9[%c2, %c0_33] : memref<8x128xf32, #tpu.memory_space<vmem>>, vector<1x128xf32>
    tpu.vector_store %arg9[%c2, %c0_33], %52 {strides = array<i32>} : memref<8x128xf32, #tpu.memory_space<vmem>>, vector<1x128xf32>,
    %54 = vector.extract_strided_slice %29 {offsets = [192, 0], sizes = [64, 128], strides = [1, 1]} : vector<512x128xf32> to vector<64x128xf32>
    %cst_34 = arith.constant dense<0xFF800000> : vector<128xf32>
    %55 = vector.multi_reduction <maximumf>, %54, %cst_34 [0] : vector<64x128xf32> to vector<128xf32>
    %56 = vector.shape_cast %55 : vector<128xf32> to vector<1x128xf32>
    %cst_35 = arith.constant -1.000000e+29 : f32
    %57 = vector.broadcast %cst_35 : f32 to vector<1x128xf32>
    %58 = arith.cmpf ogt, %56, %57 : vector<1x128xf32>
    %cst_36 = arith.constant 0.000000e+00 : f32
    %59 = vector.broadcast %cst_36 : f32 to vector<1x128xf32>
    %60 = arith.select %58, %56, %59 : vector<1x128xi1>, vector<1x128xf32>
    %c3 = arith.constant 3 : index
    %c0_37 = arith.constant 0 : index
    %61 = vector.load %arg9[%c3, %c0_37] : memref<8x128xf32, #tpu.memory_space<vmem>>, vector<1x128xf32>
    tpu.vector_store %arg9[%c3, %c0_37], %60 {strides = array<i32>} : memref<8x128xf32, #tpu.memory_space<vmem>>, vector<1x128xf32>,
    %62 = vector.extract_strided_slice %29 {offsets = [256, 0], sizes = [64, 128], strides = [1, 1]} : vector<512x128xf32> to vector<64x128xf32>
    %cst_38 = arith.constant dense<0xFF800000> : vector<128xf32>
    %63 = vector.multi_reduction <maximumf>, %62, %cst_38 [0] : vector<64x128xf32> to vector<128xf32>
    %64 = vector.shape_cast %63 : vector<128xf32> to vector<1x128xf32>
    %cst_39 = arith.constant -1.000000e+29 : f32
    %65 = vector.broadcast %cst_39 : f32 to vector<1x128xf32>
    %66 = arith.cmpf ogt, %64, %65 : vector<1x128xf32>
    %cst_40 = arith.constant 0.000000e+00 : f32
    %67 = vector.broadcast %cst_40 : f32 to vector<1x128xf32>
    %68 = arith.select %66, %64, %67 : vector<1x128xi1>, vector<1x128xf32>
    %c4 = arith.constant 4 : index
    %c0_41 = arith.constant 0 : index
    %69 = vector.load %arg9[%c4, %c0_41] : memref<8x128xf32, #tpu.memory_space<vmem>>, vector<1x128xf32>
    tpu.vector_store %arg9[%c4, %c0_41], %68 {strides = array<i32>} : memref<8x128xf32, #tpu.memory_space<vmem>>, vector<1x128xf32>,
    %70 = vector.extract_strided_slice %29 {offsets = [320, 0], sizes = [64, 128], strides = [1, 1]} : vector<512x128xf32> to vector<64x128xf32>
    %cst_42 = arith.constant dense<0xFF800000> : vector<128xf32>
    %71 = vector.multi_reduction <maximumf>, %70, %cst_42 [0] : vector<64x128xf32> to vector<128xf32>
    %72 = vector.shape_cast %71 : vector<128xf32> to vector<1x128xf32>
    %cst_43 = arith.constant -1.000000e+29 : f32
    %73 = vector.broadcast %cst_43 : f32 to vector<1x128xf32>
    %74 = arith.cmpf ogt, %72, %73 : vector<1x128xf32>
    %cst_44 = arith.constant 0.000000e+00 : f32
    %75 = vector.broadcast %cst_44 : f32 to vector<1x128xf32>
    %76 = arith.select %74, %72, %75 : vector<1x128xi1>, vector<1x128xf32>
    %c5 = arith.constant 5 : index
    %c0_45 = arith.constant 0 : index
    %77 = vector.load %arg9[%c5, %c0_45] : memref<8x128xf32, #tpu.memory_space<vmem>>, vector<1x128xf32>
    tpu.vector_store %arg9[%c5, %c0_45], %76 {strides = array<i32>} : memref<8x128xf32, #tpu.memory_space<vmem>>, vector<1x128xf32>,
    %78 = vector.extract_strided_slice %29 {offsets = [384, 0], sizes = [64, 128], strides = [1, 1]} : vector<512x128xf32> to vector<64x128xf32>
    %cst_46 = arith.constant dense<0xFF800000> : vector<128xf32>
    %79 = vector.multi_reduction <maximumf>, %78, %cst_46 [0] : vector<64x128xf32> to vector<128xf32>
    %80 = vector.shape_cast %79 : vector<128xf32> to vector<1x128xf32>
    %cst_47 = arith.constant -1.000000e+29 : f32
    %81 = vector.broadcast %cst_47 : f32 to vector<1x128xf32>
    %82 = arith.cmpf ogt, %80, %81 : vector<1x128xf32>
    %cst_48 = arith.constant 0.000000e+00 : f32
    %83 = vector.broadcast %cst_48 : f32 to vector<1x128xf32>
    %84 = arith.select %82, %80, %83 : vector<1x128xi1>, vector<1x128xf32>
    %c6 = arith.constant 6 : index
    %c0_49 = arith.constant 0 : index
    %85 = vector.load %arg9[%c6, %c0_49] : memref<8x128xf32, #tpu.memory_space<vmem>>, vector<1x128xf32>
    tpu.vector_store %arg9[%c6, %c0_49], %84 {strides = array<i32>} : memref<8x128xf32, #tpu.memory_space<vmem>>, vector<1x128xf32>,
    %86 = vector.extract_strided_slice %29 {offsets = [448, 0], sizes = [64, 128], strides = [1, 1]} : vector<512x128xf32> to vector<64x128xf32>
    %cst_50 = arith.constant dense<0xFF800000> : vector<128xf32>
    %87 = vector.multi_reduction <maximumf>, %86, %cst_50 [0] : vector<64x128xf32> to vector<128xf32>
    %88 = vector.shape_cast %87 : vector<128xf32> to vector<1x128xf32>
    %cst_51 = arith.constant -1.000000e+29 : f32
    %89 = vector.broadcast %cst_51 : f32 to vector<1x128xf32>
    %90 = arith.cmpf ogt, %88, %89 : vector<1x128xf32>
    %cst_52 = arith.constant 0.000000e+00 : f32
    %91 = vector.broadcast %cst_52 : f32 to vector<1x128xf32>
    %92 = arith.select %90, %88, %91 : vector<1x128xi1>, vector<1x128xf32>
    %c7 = arith.constant 7 : index
    %c0_53 = arith.constant 0 : index
    %93 = vector.load %arg9[%c7, %c0_53] : memref<8x128xf32, #tpu.memory_space<vmem>>, vector<1x128xf32>
    tpu.vector_store %arg9[%c7, %c0_53], %92 {strides = array<i32>} : memref<8x128xf32, #tpu.memory_space<vmem>>, vector<1x128xf32>,
    return
  }
  func.func @transform_0(%arg0: i32) -> (i32, i32) {
    %c0_i32 = arith.constant 0 : i32
    %c0_i32_0 = arith.constant 0 : i32
    return %arg0, %c0_i32 : i32, i32
  }
  func.func @transform_1(%arg0: i32) -> (i32, i32) {
    %c0_i32 = arith.constant 0 : i32
    %c0_i32_0 = arith.constant 0 : i32
    return %arg0, %c0_i32 : i32, i32
  }
  func.func @transform_2(%arg0: i32) -> (i32, i32) {
    %c0_i32 = arith.constant 0 : i32
    %c0_i32_0 = arith.constant 0 : i32
    %c0_i32_1 = arith.constant 0 : i32
    return %c0_i32, %c0_i32_0 : i32, i32
  }
  func.func @transform_3(%arg0: i32) -> (i32, i32) {
    %c0_i32 = arith.constant 0 : i32
    %c0_i32_0 = arith.constant 0 : i32
    %c0_i32_1 = arith.constant 0 : i32
    return %c0_i32, %c0_i32_0 : i32, i32
  }
  func.func @transform_4(%arg0: i32) -> (i32, i32) {
    %c0_i32 = arith.constant 0 : i32
    %c0_i32_0 = arith.constant 0 : i32
    %c0_i32_1 = arith.constant 0 : i32
    return %c0_i32, %c0_i32_0 : i32, i32
  }
  func.func @transform_5(%arg0: i32) -> (i32, i32) {
    %c0_i32 = arith.constant 0 : i32
    %c0_i32_0 = arith.constant 0 : i32
    %c0_i32_1 = arith.constant 0 : i32
    return %c0_i32, %c0_i32_0 : i32, i32
  }
  func.func @transform_6(%arg0: i32) -> (i32, i32) {
    %c0_i32 = arith.constant 0 : i32
    %c0_i32_0 = arith.constant 0 : i32
    %c0_i32_1 = arith.constant 0 : i32
    return %c0_i32, %c0_i32_0 : i32, i32
  }
  func.func @transform_7(%arg0: i32) -> (i32, i32) {
    %c0_i32 = arith.constant 0 : i32
    %c0_i32_0 = arith.constant 0 : i32
    %c0_i32_1 = arith.constant 0 : i32
    return %c0_i32, %c0_i32_0 : i32, i32
  }
  func.func @transform_8(%arg0: i32) -> (i32, i32) {
    %c0_i32 = arith.constant 0 : i32
    %c0_i32_0 = arith.constant 0 : i32
    return %arg0, %c0_i32 : i32, i32
  }
}

</mosaic_0001>

<bundles_post_ra>
// kernel: tpu_custom_call.1
= control target key start
LH: loop header
LB: loop body
LE: loop exit
PB: predicated region body
PF: predicated region fallthrough
CT: control target
= control target key end

     0   :  { %13 = vsyncpa [#allocation3], 0  ;;  %s3953_s0 = inlined_call_operand.vmem [shape: f32[1664,7], index: 0, kind: input, shape index: {}]   ;;  %s3954_s1 = inlined_call_operand.vmem [shape: f32[1664,1], index: 1, kind: input, shape index: {}]   ;;  %s3955_s2 = inlined_call_operand.vmem [shape: bf16[7,128], index: 2, kind: input, shape index: {}]   ;;  %s3956_s3 = inlined_call_operand.vmem [shape: f32[1,128], index: 3, kind: input, shape index: {}]   ;;  %s3957_s4 = inlined_call_operand.vmem [shape: bf16[128,128], index: 4, kind: input, shape index: {}]   ;;  %s3958_s5 = inlined_call_operand.vmem [shape: f32[1,128], index: 5, kind: input, shape index: {}]   ;;  %s3959_s6 = inlined_call_operand.vmem [shape: bf16[128,128], index: 6, kind: input, shape index: {}]   ;;  %s3960_s7 = inlined_call_operand.vmem [shape: f32[1,128], index: 7, kind: input, shape index: {}]   ;;  %s3961_s8 = inlined_call_operand.hbm [shape: f32[26,128], index: 8, kind: output, shape index: {}]  }
   0x1   :  { %15 = vsyncpa [#allocation3 + $0x1], 0  ;;  %s3077_s27 = smov 0   ;;  %s3079_s28 = smov 0  }
   0x2   :  { %s3081_s29 = smov 0   ;;  %s3083_s30 = smov 0  }
   0x3 LB: > { %s3098_s9 = sadd.s32 4294967295, %s3027_s30   ;;  %s2503_s10 = sadd.s32 4294967294, %s3027_s30   ;;  %s3027_s30 = sphi %s3083_s30, %s3967_s30   ;;  %s3023_s29 = sphi %s3081_s29, %s3966_s29   ;;  %s3019_s28 = sphi %s3079_s28, %s3965_s28   ;;  %s3015_s27 = sphi %s3077_s27, %s3964_s27  }
   0x4   : > { %s3102_s11 = sadd.s32 1, %s3027_s30   ;;  %s206_s12 = sadd.s32 1, %s3023_s29 }
   0x5   : > { %s203_s13 = ssub.s32 %s3027_s30, %s3102_s11  ;;  %p216_p0 = scmp.ne.s32.totalorder %s3023_s29, %s3019_s28 }
   0x6   : > { %p204_p1 = scmp.eq.s32.totalorder %s203_s13, 0  ;;  %p217_p2 = scmp.eq.s32.totalorder %s3098_s9, 3 }
   0x7   : > { %p222_p3 = scmp.ne.s32.totalorder %s3019_s28, %s3015_s27  ;;  %p223_p4 = scmp.eq.s32.totalorder %s2503_s10, 3 }
   0x8   : > { %s3113_s14 = scalar_select %p204_p1, %s3023_s29, %s206_s12  }
   0x9   : > { %p3115_p5 = por %p217_p2, %p216_p0  ;;  %p3119_p6 = por %p223_p4, %p222_p3 }
   0xa   : > { %p2506_p7 = scmp.ge.s32.totalorder %s3027_s30, 1  ;;  %p293_p8 = scmp.lt.s32.totalorder %s3027_s30, 5 }
   0xc   : > { %p294_p9 = pnand %p2506_p7, %p293_p8 }
   0xd   : > { %s2508_s19 = sshll.u32 (!%p294_p9), %s3098_s9, 6  ;;  %s337_s13 = sand.u32 (!%p294_p9), 1, %s3019_s28  }
   0xe   : > { %297 = sbr.rel (%p294_p9) target bundleno = 795 (0x31b), region = 52  ;;  %p345_p10 = scmp.lt.s32.totalorder (!%p294_p9), %s2508_s19, 207 }
   0xf   : > { %s2507_s17 = sshll.u32 (!%p294_p9), %s337_s13, 3  ;;  %s2419_s26 = scalar_lea.sflag (!%p294_p9), [#allocation3], %s337_s13 }
  0x10   : > { %s3734_s18 = scalar_lea.vmem (!%p294_p9), [#allocation2], %s2507_s17 }
  0x11   : > { %s2432_s20 = sshll.u32 (!%p294_p9), %s3734_s18, 4  ;;  %s2433_s20 = int_to_ptr.vmem [resolvable:$true] %s2432_s20 }
  0x13   : > { %v465_v0 = vld [vmem:[%s3955_s2] sm:$0xf]  ;;  %vm570_vm0 = vcmask 1042432   ;;  %vm571_vm1 = vcmask 1043456   ;;  %v3029_v1 = vmov 65535   ;;  %s3969_s19 = smov (!%p345_p10, %s2508_s19), 207 }
  0x14   : > { %v572_v2 = vsel %vm570_vm0, 4294967295, %v3029_v1  ;;  %v2951_v5 = vld [vmem:[%s3957_s4 + $0x38] sm:$0xff]   ;;  %s2509_s22 = sshll.u32 %s3969_s19, 3  ;;  %vm473_vm2 = vcmask 56320   ;;  %v2952_v32 = vld [vmem:[%s3957_s4 + $0x30] sm:$0xff]   ;;  %v2953_v41 = vld [vmem:[%s3957_s4 + $0x28] sm:$0xff]  }
  0x15   : > { %v573_v3 = vsel %vm571_vm1, %v572_v2, 0  ;;  %s3140_s25 = scalar_lea.vmem %s3953_s0, %s2509_s22  ;;  %v2954_v46 = vld [vmem:[%s3957_s4 + $0x20] sm:$0xff]   ;;  %v2955_v53 = vld [vmem:[%s3957_s4 + $0x18] sm:$0xff]   ;;  %v2956_v60 = vld [vmem:[%s3957_s4 + $0x10] sm:$0xff]   ;;  %s3278_s10 = scalar_lea.vmem %s3954_s1, %s2509_s22 }
  0x16   : > { %v575_v4 = vand.u32 %v573_v3, %v465_v0  ;;  %v369_v6 = vld [vmem:[%s3140_s25] sm:$0xff]  ;;  %v370_v7 = vld [vmem:[%s3140_s25 + $0x8] sm:$0xff]  ;;  %v371_v8 = vld [vmem:[%s3140_s25 + $0x10] sm:$0xff]  ;;  %s2967_s19 = scalar_lea.vmem %s2433_s20, 128  ;;  %s3031_s22 = smov [#allocation2]  }
  0x17   : > { %v433_v9 = vpack.c.bf16 %v370_v7, %v369_v6  ;;  %v372_v10 = vld [vmem:[%s3140_s25 + $0x18] sm:$0xff]  ;;  %v373_v11 = vld [vmem:[%s3140_s25 + $0x20] sm:$0xff]  ;;  %v374_v12 = vld [vmem:[%s3140_s25 + $0x28] sm:$0xff]  ;;  %p2968_p11 = scmp.ne.s32.totalorder %s2433_s20, %s2967_s19 }
  0x18   : > { %2680 = vmatprep.subr.bf16.mxu0 %v575_v4  ;;  %2906 = vmatprep.subr.bf16.mxu1 %v575_v4  ;;  %v434_v13 = vpack.c.bf16 %v372_v10, %v371_v8  ;;  %v435_v14 = vpack.c.bf16 %v374_v12, %v373_v11  ;;  %v375_v15 = vld [vmem:[%s3140_s25 + $0x30] sm:$0xff]  ;;  %v376_v16 = vld [vmem:[%s3140_s25 + $0x38] sm:$0xff]  ;;  %v377_v17 = vld [vmem:[%s3140_s25 + $0x40] sm:$0xff] }
  0x19   : > { %2681 = vmatpush3.bf16.msra.mxu0 %v575_v4  ;;  %2907 = vmatpush3.bf16.msra.mxu1 %v575_v4  ;;  %v378_v18 = vld [vmem:[%s3140_s25 + $0x48] sm:$0xff]  ;;  %v436_v19 = vpack.c.bf16 %v376_v16, %v375_v15  ;;  %v401_v21 = vld [vmem:[%s3140_s25 + $0x100] sm:$0xff]  ;;  %v403_v23 = vld [vmem:[%s3140_s25 + $0x110] sm:$0xff]  ;;  %p2969_p12 = pnand %p2968_p11, %p3115_p5 }
  0x1a   : > { %2746 = vmatprep.subr.bf16.mxu1 %v2951_v5  ;;  %2682 = vmatprep.mubr.msk.bf16.mxu0 %vm473_vm2, %v433_v9  ;;  %v437_v20 = vpack.c.bf16 %v378_v18, %v377_v17  ;;  %v402_v22 = vld [vmem:[%s3140_s25 + $0x108] sm:$0xff]  ;;  %v404_v24 = vld [vmem:[%s3140_s25 + $0x118] sm:$0xff]  ;;  %v405_v27 = vld [vmem:[%s3140_s25 + $0x120] sm:$0xff] }
  0x1b   : > { %v449_v25 = vpack.c.bf16 %v402_v22, %v401_v21  ;;  %v450_v26 = vpack.c.bf16 %v404_v24, %v403_v23  ;;  %v406_v28 = vld [vmem:[%s3140_s25 + $0x128] sm:$0xff]  ;;  %v379_v29 = vld [vmem:[%s3140_s25 + $0x50] sm:$0xff]  ;;  %v380_v30 = vld [vmem:[%s3140_s25 + $0x58] sm:$0xff]  ;;  %p2970_p13 = pneg %p2969_p12 }
  0x1c   : > { %2683 = vmatmul.mubr.msk.bf16.vlgmr.msra.gmra.mxu0 %vm473_vm2, %v434_v13  ;;  %v451_v31 = vpack.c.bf16 %v406_v28, %v405_v27  ;;  %v381_v33 = vld [vmem:[%s3140_s25 + $0x60] sm:$0xff]  ;;  %v382_v34 = vld [vmem:[%s3140_s25 + $0x68] sm:$0xff]  ;;  %v438_v35 = vpack.c.bf16 %v380_v30, %v379_v29  ;;  %v407_v36 = vld [vmem:[%s3140_s25 + $0x130] sm:$0xff] }
  0x1d   : > { %2686 = vmatprep.mubr.msk.bf16.mxu0 %vm473_vm2, %v435_v14  ;;  %2714 = vmatprep.mubr.msk.bf16.mxu1 %vm473_vm2, %v449_v25  ;;  %v408_v37 = vld [vmem:[%s3140_s25 + $0x138] sm:$0xff]  ;;  %v439_v38 = vpack.c.bf16 %v382_v34, %v381_v33  ;;  %v409_v39 = vld [vmem:[%s3140_s25 + $0x140] sm:$0xff]  ;;  %v410_v40 = vld [vmem:[%s3140_s25 + $0x148] sm:$0xff] }
  0x1e   : > { %2715 = vmatmul.mubr.msk.bf16.vlgmr.msra.gmra.mxu1 %vm473_vm2, %v450_v26  ;;  %v452_v42 = vpack.c.bf16 %v408_v37, %v407_v36  ;;  %v383_v43 = vld [vmem:[%s3140_s25 + $0x70] sm:$0xff]  ;;  %v384_v44 = vld [vmem:[%s3140_s25 + $0x78] sm:$0xff]  ;;  %v453_v45 = vpack.c.bf16 %v410_v40, %v409_v39  ;;  %v385_v47 = vld [vmem:[%s3140_s25 + $0x80] sm:$0xff] }
  0x1f   : > { %2718 = vmatprep.mubr.msk.bf16.mxu1 %vm473_vm2, %v451_v31  ;;  %2747 = vmatpush3.bf16.msra.mxu1 %v2951_v5  ;;  %v386_v48 = vld [vmem:[%s3140_s25 + $0x88] sm:$0xff]  ;;  %v411_v49 = vld [vmem:[%s3140_s25 + $0x150] sm:$0xff]  ;;  %v412_v50 = vld [vmem:[%s3140_s25 + $0x158] sm:$0xff]  ;;  %v440_v54 = vpack.c.bf16 %v384_v44, %v383_v43 }
  0x20   : > { %2748 = vmatprep.subr.bf16.mxu1 %v2952_v32  ;;  %v413_v51 = vld [vmem:[%s3140_s25 + $0x160] sm:$0xff]  ;;  %v414_v52 = vld [vmem:[%s3140_s25 + $0x168] sm:$0xff]  ;;  %v441_v55 = vpack.c.bf16 %v386_v48, %v385_v47  ;;  %v454_v56 = vpack.c.bf16 %v412_v50, %v411_v49  ;;  %v387_v58 = vld [vmem:[%s3140_s25 + $0x90] sm:$0xff] }
  0x21   : > { %v455_v57 = vpack.c.bf16 %v414_v52, %v413_v51  ;;  %v388_v59 = vld [vmem:[%s3140_s25 + $0x98] sm:$0xff]  ;;  %v389_v61 = vld [vmem:[%s3140_s25 + $0xa0] sm:$0xff]  ;;  %v390_v62 = vld [vmem:[%s3140_s25 + $0xa8] sm:$0xff] }
  0x22   : > { %v442_v63 = vpack.c.bf16 %v388_v59, %v387_v58  ;;  %v415_v0 = vld [vmem:[%s3140_s25 + $0x170] sm:$0xff]  ;;  %v416_v1 = vld [vmem:[%s3140_s25 + $0x178] sm:$0xff]  ;;  %v443_v2 = vpack.c.bf16 %v390_v62, %v389_v61  ;;  %v417_v3 = vld [vmem:[%s3140_s25 + $0x180] sm:$0xff] }
  0x23   : > { %2749 = vmatpush3.bf16.msra.mxu1 %v2952_v32  ;;  %v418_v4 = vld [vmem:[%s3140_s25 + $0x188] sm:$0xff]  ;;  %v456_v6 = vpack.c.bf16 %v416_v1, %v415_v0  ;;  %v391_v8 = vld [vmem:[%s3140_s25 + $0xb0] sm:$0xff]  ;;  %v392_v9 = vld [vmem:[%s3140_s25 + $0xb8] sm:$0xff] }
  0x24   : > { %2687 = vmatmul.mubr.msk.bf16.gmra.mxu0 %vm473_vm2, %v436_v19  ;;  %2750 = vmatprep.subr.bf16.mxu1 %v2953_v41  ;;  %v2957_v5 = vld [vmem:[%s3957_s4 + $0x8] sm:$0xff]   ;;  %v457_v7 = vpack.c.bf16 %v418_v4, %v417_v3  ;;  %v393_v10 = vld [vmem:[%s3140_s25 + $0xc0] sm:$0xff]  ;;  %v444_v12 = vpack.c.bf16 %v392_v9, %v391_v8  ;;  %v419_v13 = vld [vmem:[%s3140_s25 + $0x190] sm:$0xff] }
  0x25   : > { %2690 = vmatprep.mubr.msk.bf16.mxu0 %vm473_vm2, %v437_v20  ;;  %v394_v11 = vld [vmem:[%s3140_s25 + $0xc8] sm:$0xff]  ;;  %v420_v14 = vld [vmem:[%s3140_s25 + $0x198] sm:$0xff]  ;;  %v421_v16 = vld [vmem:[%s3140_s25 + $0x1a0] sm:$0xff] }
  0x26   : > { %2719 = vmatmul.mubr.msk.bf16.gmra.mxu1 %vm473_vm2, %v452_v42  ;;  %v445_v15 = vpack.c.bf16 %v394_v11, %v393_v10  ;;  %v422_v17 = vld [vmem:[%s3140_s25 + $0x1a8] sm:$0xff]  ;;  %v458_v18 = vpack.c.bf16 %v420_v14, %v419_v13  ;;  %v395_v20 = vld [vmem:[%s3140_s25 + $0xd0] sm:$0xff]  ;;  %v396_v21 = vld [vmem:[%s3140_s25 + $0xd8] sm:$0xff] }
  0x27   : > { %2722 = vmatprep.mubr.msk.bf16.mxu1 %vm473_vm2, %v453_v45  ;;  %2751 = vmatpush3.bf16.msra.mxu1 %v2953_v41  ;;  %v459_v19 = vpack.c.bf16 %v422_v17, %v421_v16  ;;  %v397_v22 = vld [vmem:[%s3140_s25 + $0xe0] sm:$0xff]  ;;  %v398_v23 = vld [vmem:[%s3140_s25 + $0xe8] sm:$0xff]  ;;  %v446_v24 = vpack.c.bf16 %v396_v21, %v395_v20  ;;  %v423_v25 = vld [vmem:[%s3140_s25 + $0x1b0] sm:$0xff] }
  0x28   : > { %2752 = vmatprep.subr.bf16.mxu1 %v2954_v46  ;;  %v424_v26 = vld [vmem:[%s3140_s25 + $0x1b8] sm:$0xff]  ;;  %v447_v27 = vpack.c.bf16 %v398_v23, %v397_v22  ;;  %v425_v28 = vld [vmem:[%s3140_s25 + $0x1c0] sm:$0xff]  ;;  %v426_v29 = vld [vmem:[%s3140_s25 + $0x1c8] sm:$0xff] }
  0x29   : > { %v460_v30 = vpack.c.bf16 %v424_v26, %v423_v25  ;;  %v461_v31 = vpack.c.bf16 %v426_v29, %v425_v28  ;;  %v399_v32 = vld [vmem:[%s3140_s25 + $0xf0] sm:$0xff]  ;;  %v400_v33 = vld [vmem:[%s3140_s25 + $0xf8] sm:$0xff]  ;;  %v429_v37 = vld [vmem:[%s3140_s25 + $0x1e0] sm:$0xff] }
  0x2a   : > { %v448_v34 = vpack.c.bf16 %v400_v33, %v399_v32  ;;  %v428_v36 = vld [vmem:[%s3140_s25 + $0x1d8] sm:$0xff]  ;;  %v431_v41 = vld [vmem:[%s3140_s25 + $0x1f0] sm:$0xff]  ;;  %v2958_v44 = vld [vmem:[%s3957_s4] sm:$0xff]  }
  0x2b   : > { %2753 = vmatpush3.bf16.msra.mxu1 %v2954_v46  ;;  %v432_v42 = vld [vmem:[%s3140_s25 + $0x1f8] sm:$0xff]  ;;  %v3262_v47 = vld [vmem:[%s3956_s3] ss:$0 sm:$0xff]  ;;  %v1779_v62 = vld [vmem:[%s3278_s10 + $0x8] sm:$0xff] }
  0x2c   : > { %2691 = vmatmul.mubr.msk.bf16.gmra.mxu0 %vm473_vm2, %v438_v35  ;;  %2754 = vmatprep.subr.bf16.mxu1 %v2955_v53  ;;  %v427_v35 = vld [vmem:[%s3140_s25 + $0x1d0] sm:$0xff]  ;;  %v464_v43 = vpack.c.bf16 %v432_v42, %v431_v41  ;;  %v1778_v58 = vld [vmem:[%s3278_s10] sm:$0xff]  ;;  %v1781_v59 = vld [vmem:[%s3278_s10 + $0x18] sm:$0xff]  ;;  %vm1843_vm6 = vcmp.gt.f32.partialorder %v1779_v62, 0.5 }
  0x2d   : > { %2694 = vmatprep.mubr.msk.bf16.mxu0 %vm473_vm2, %v439_v38  ;;  %v430_v38 = vld [vmem:[%s3140_s25 + $0x1e8] sm:$0xff]  ;;  %v462_v39 = vpack.c.bf16 %v428_v36, %v427_v35  ;;  %vm1842_vm4 = vcmp.gt.f32.partialorder %v1778_v58, 0.5  ;;  %vm1845_vm5 = vcmp.gt.f32.partialorder %v1781_v59, 0.5  ;;  %v1785_v20 = vld [vmem:[%s3278_s10 + $0x38] sm:$0xff]  ;;  %v1784_v21 = vld [vmem:[%s3278_s10 + $0x30] sm:$0xff]  ;;  %s2564_s25 = sshll.u32 %s3098_s9, 7 }
  0x2e   : > { %2723 = vmatmul.mubr.msk.bf16.gmra.mxu1 %vm473_vm2, %v454_v56  ;;  %v463_v40 = vpack.c.bf16 %v430_v38, %v429_v37  ;;  %v3030_v56 = vmov 0   ;;  %vm1849_vm9 = vcmp.gt.f32.partialorder %v1785_v20, 0.5  ;;  %vm1848_vm10 = vcmp.gt.f32.partialorder %v1784_v21, 0.5  ;;  %v1787_v33 = vld [vmem:[%s3278_s10 + $0x48] sm:$0xff]  ;;  %v2963_v35 = vld [vmem:[%s3959_s6 + $0x18] sm:$0xff]   ;;  %s3915_s24 = scalar_lea.hbm %s3961_s8, %s2564_s25  ;;  %s2971_s9 = sshll.u32 %s3031_s22, 4  ;;  %s2972_s9 = int_to_ptr.vmem [resolvable:$false] %s2971_s9 }
  0x2f   : > { %2726 = vmatprep.mubr.msk.bf16.mxu1 %vm473_vm2, %v455_v57  ;;  %2755 = vmatpush3.bf16.msra.mxu1 %v2955_v53  ;;  %v2959_v53 = vld [vmem:[%s3959_s6 + $0x38] sm:$0xff]   ;;  %v1780_v57 = vld [vmem:[%s3278_s10 + $0x10] sm:$0xff]  ;;  %v1906_v4 = vsel %vm1842_vm4, 1, %v3030_v56  ;;  %v1907_v13 = vsel %vm1843_vm6, 1, %v3030_v56  ;;  %v1912_v41 = vsel %vm1848_vm10, 1, %v3030_v56  ;;  %vm1851_vm11 = vcmp.gt.f32.partialorder %v1787_v33, 0.5  ;;  %p2974_p0 = scmp.lt.s32.totalorder %s2433_s20, %s2972_s9 }
  0x30   : > { %2756 = vmatprep.subr.bf16.mxu1 %v2956_v60  ;;  %2950 = vset.pattern.permute.xlu1 %v3030_v56  ;;  %vm1844_vm3 = vcmp.gt.f32.partialorder %v1780_v57, 0.5 }
  0x31   : > { %2949 = vset.pattern.permute.xlu0 %v3030_v56  ;;  %2826 = vmatprep.subr.bf16.mxu0 %v2959_v53  ;;  %v1908_v1 = vsel %vm1844_vm3, 1, %v3030_v56 }
  0x32   : > { %2827 = vmatpush3.bf16.msra.mxu0 %v2959_v53  ;;  %1977 = vperm.xlu1 %2950, %v1908_v1   ;;  %v2965_v1 = vld [vmem:[%s3959_s6 + $0x8] sm:$0xff]  }
  0x33   : > { %2757 = vmatpush3.bf16.msra.mxu1 %v2956_v60  ;;  %1971 = vperm.xlu0 %2949, %v1906_v4  }
  0x34   : > { %2695 = vmatmul.mubr.msk.bf16.gmra.mxu0 %vm473_vm2, %v440_v54  ;;  %2758 = vmatprep.subr.bf16.mxu1 %v2957_v5  ;;  %v2960_v54 = vld [vmem:[%s3959_s6 + $0x30] sm:$0xff]  }
  0x35   : > { %2698 = vmatprep.mubr.msk.bf16.mxu0 %vm473_vm2, %v441_v55  ;;  %2828 = vmatprep.subr.bf16.mxu0 %v2960_v54 }
  0x36   : > { %2727 = vmatmul.mubr.msk.bf16.gmra.mxu1 %vm473_vm2, %v456_v6  ;;  %v1783_v6 = vld [vmem:[%s3278_s10 + $0x28] sm:$0xff]  ;;  %2829 = vmatpush3.bf16.msra.mxu0 %v2960_v54 }
  0x37   : > { %2730 = vmatprep.mubr.msk.bf16.mxu1 %vm473_vm2, %v457_v7  ;;  %2759 = vmatpush3.bf16.msra.mxu1 %v2957_v5  ;;  %v2961_v5 = vld [vmem:[%s3959_s6 + $0x28] sm:$0xff]   ;;  %v1782_v7 = vld [vmem:[%s3278_s10 + $0x20] sm:$0xff]  ;;  %vm1847_vm7 = vcmp.gt.f32.partialorder %v1783_v6, 0.5 }
  0x38   : > { %2760 = vmatprep.subr.bf16.mxu1 %v2958_v44  ;;  %vm1846_vm8 = vcmp.gt.f32.partialorder %v1782_v7, 0.5  ;;  %2830 = vmatprep.subr.bf16.mxu0 %v2961_v5  ;;  %v1911_v26 = vsel %vm1847_vm7, 1, %v3030_v56 }
  0x39   : > { %1974 = vperm.xlu0 %2949, %v1907_v13  }
  0x3a   : > { %2831 = vmatpush3.bf16.msra.mxu0 %v2961_v5 }
  0x3b   : > { %2761 = vmatpush3.bf16.msra.mxu1 %v2958_v44 }
  0x3c   : > { %2699 = vmatmul.mubr.msk.bf16.gmra.mxu0 %vm473_vm2, %v442_v63 }
  0x3d   : > { %2702 = vmatprep.mubr.msk.bf16.mxu0 %vm473_vm2, %v443_v2 }
  0x3e   : > { %2731 = vmatmul.mubr.msk.bf16.gmra.mxu1 %vm473_vm2, %v458_v18 }
  0x3f   : > { %2734 = vmatprep.mubr.msk.bf16.mxu1 %vm473_vm2, %v459_v19  ;;  %v2962_v19 = vld [vmem:[%s3959_s6 + $0x20] sm:$0xff]  }
  0x40   : > { %2832 = vmatprep.subr.bf16.mxu0 %v2962_v19 }
  0x41   : > { %2833 = vmatpush3.bf16.msra.mxu0 %v2962_v19 }
  0x42   : > { %2834 = vmatprep.subr.bf16.mxu0 %v2963_v35 }
  0x44   : > { %2703 = vmatmul.mubr.msk.bf16.gmra.mxu0 %vm473_vm2, %v444_v12  ;;  %v1909_v12 = vsel %vm1845_vm5, 1, %v3030_v56 }
  0x45   : > { %2706 = vmatprep.mubr.msk.bf16.mxu0 %vm473_vm2, %v445_v15  ;;  %1980 = vperm.xlu1 %2950, %v1909_v12  }
  0x46   : > { %2735 = vmatmul.mubr.msk.bf16.gmra.mxu1 %vm473_vm2, %v460_v30  ;;  %2835 = vmatpush3.bf16.msra.mxu0 %v2963_v35 }
  0x47   : > { %2738 = vmatprep.mubr.msk.bf16.mxu1 %vm473_vm2, %v461_v31 }
  0x49   : > { %1986 = vperm.xlu1 %2950, %v1911_v26  }
  0x4c   : > { %2707 = vmatmul.mubr.msk.bf16.gmra.mxu0 %vm473_vm2, %v446_v24 }
  0x4d   : > { %2710 = vmatprep.mubr.msk.bf16.mxu0 %vm473_vm2, %v447_v27  ;;  %v1910_v27 = vsel %vm1846_vm8, 1, %v3030_v56 }
  0x4e   : > { %2739 = vmatmul.mubr.msk.bf16.gmra.mxu1 %vm473_vm2, %v462_v39  ;;  %1983 = vperm.xlu0 %2949, %v1910_v27  }
  0x4f   : > { %2742 = vmatprep.mubr.msk.bf16.mxu1 %vm473_vm2, %v463_v40  ;;  %v1913_v40 = vsel %vm1849_vm9, 1, %v3030_v56 }
  0x50   : > { %1992 = vperm.xlu1 %2950, %v1913_v40  }
  0x52   : > { %1989 = vperm.xlu0 %2949, %v1912_v41  }
  0x54   : > { %2711 = vmatmul.mubr.msk.bf16.gmra.mxu0 %vm473_vm2, %v448_v34  ;;  %v1786_v34 = vld [vmem:[%s3278_s10 + $0x40] sm:$0xff] }
  0x55   : > { %vm1850_vm12 = vcmp.gt.f32.partialorder %v1786_v34, 0.5 }
  0x56   : > { %2743 = vmatmul.mubr.msk.bf16.gmra.mxu1 %vm473_vm2, %v464_v43  ;;  %v1914_v57 = vsel %vm1850_vm12, 1, %v3030_v56 }
  0x57   : > { %1995 = vperm.xlu0 %2949, %v1914_v57  }
  0xdc   : > { %v2684_v45 = vpop.f32.mrf.mxu0 }
  0xdd   : > { %v620_v51 = vadd.f32 %v2684_v45, %v3262_v47 }
  0xde   : > { %v611_v46 = vpop.f32.mrf.mxu0  ;;  %v3294_v9 = vpop.f32.mrf.mxu1 }
  0xdf   : > { %v612_v49 = vadd.f32 %v3262_v47, %v611_v46  ;;  %v868_v2 = vmax.f32 %v620_v51, 0.0 }
  0xe0   : > { %v2685_v48 = vpop.f32.mrf.mxu0  ;;  %v3300_v16 = vpop.f32.mrf.mxu1 }
  0xe1   : > { %v623_v50 = vadd.f32 %v2685_v48, %v3262_v47  ;;  %v866_v63 = vmax.f32 %v612_v49, 0.0  ;;  %v1789_v48 = vld [vmem:[%s3278_s10 + $0x58] sm:$0xff]  ;;  %v1788_v49 = vld [vmem:[%s3278_s10 + $0x50] sm:$0xff] }
  0xe2   : > { %v614_v52 = vpop.f32.mrf.mxu0  ;;  %v3309_v23 = vpop.f32.mrf.mxu1  ;;  %vm1853_vm13 = vcmp.gt.f32.partialorder %v1789_v48, 0.5  ;;  %vm1852_vm14 = vcmp.gt.f32.partialorder %v1788_v49, 0.5 }
  0xe3   : > { %v615_v55 = vadd.f32 %v3262_v47, %v614_v52  ;;  %v869_v60 = vmax.f32 %v623_v50, 0.0  ;;  %v2964_v50 = vld [vmem:[%s3959_s6 + $0x10] sm:$0xff]   ;;  %v1917_v6 = vsel %vm1853_vm13, 1, %v3030_v56  ;;  %v1916_v7 = vsel %vm1852_vm14, 1, %v3030_v56 }
  0xe4   : > { %v2688_v61 = vpop.f32.mrf.mxu0  ;;  %v3313_v30 = vpop.f32.mrf.mxu1  ;;  %2836 = vmatprep.subr.bf16.mxu0 %v2964_v50  ;;  %2001 = vperm.xlu0 %2949, %v1916_v7  }
  0xe5   : > { %v867_v0 = vmax.f32 %v615_v55, 0.0  ;;  %v931_v10 = vpack.c.bf16 %v869_v60, %v868_v2  ;;  %v636_v17 = vadd.f32 %v2688_v61, %v3262_v47  ;;  %v1915_v55 = vsel %vm1851_vm11, 1, %v3030_v56  ;;  %2837 = vmatpush3.bf16.msra.mxu0 %v2964_v50 }
  0xe6   : > { %v627_v3 = vpop.f32.mrf.mxu0  ;;  %v3320_v37 = vpop.f32.mrf.mxu1  ;;  %1998 = vperm.xlu1 %2950, %v1915_v55   ;;  %2838 = vmatprep.subr.bf16.mxu0 %v2965_v1 }
  0xe7   : > { %v930_v8 = vpack.c.bf16 %v867_v0, %v866_v63  ;;  %v628_v14 = vadd.f32 %v3262_v47, %v627_v3  ;;  %v872_v31 = vmax.f32 %v636_v17, 0.0  ;;  %v1791_v63 = vld [vmem:[%s3278_s10 + $0x68] sm:$0xff]  ;;  %v1790_v0 = vld [vmem:[%s3278_s10 + $0x60] sm:$0xff] }
  0xe8   : > { %v2689_v11 = vpop.f32.mrf.mxu0  ;;  %v3326_v44 = vpop.f32.mrf.mxu1  ;;  %vm1855_vm15 = vcmp.gt.f32.partialorder %v1791_v63, 0.5  ;;  %vm1854_vm0 = vcmp.gt.f32.partialorder %v1790_v0, 0.5 }
  0xe9   : > { %v639_v15 = vadd.f32 %v2689_v11, %v3262_v47  ;;  %2762 = vmatprep.mubr.bf16.mxu1 %v930_v8  ;;  %v870_v28 = vmax.f32 %v628_v14, 0.0  ;;  %v1793_v14 = vld [vmem:[%s3278_s10 + $0x78] sm:$0xff]  ;;  %v1919_v21 = vsel %vm1855_vm15, 1, %v3030_v56  ;;  %2839 = vmatpush3.bf16.msra.mxu0 %v2965_v1 }
  0xea   : > { %v630_v18 = vpop.f32.mrf.mxu0  ;;  %2763 = vmatmul.mubr.bf16.vlgmr.msra.gmra.mxu1 %v931_v10  ;;  %v3335_v52 = vpop.f32.mrf.mxu1  ;;  %2004 = vperm.xlu1 %2950, %v1917_v6   ;;  %vm1857_vm1 = vcmp.gt.f32.partialorder %v1793_v14, 0.5 }
  0xeb   : > { %v631_v22 = vadd.f32 %v3262_v47, %v630_v18  ;;  %v873_v24 = vmax.f32 %v639_v15, 0.0  ;;  %v1792_v15 = vld [vmem:[%s3278_s10 + $0x70] sm:$0xff] }
  0xec   : > { %v2692_v25 = vpop.f32.mrf.mxu0  ;;  %v3339_v60 = vpop.f32.mrf.mxu1  ;;  %vm1856_vm2 = vcmp.gt.f32.partialorder %v1792_v15, 0.5 }
  0xed   : > { %v871_v29 = vmax.f32 %v631_v22, 0.0  ;;  %v933_v38 = vpack.c.bf16 %v873_v24, %v872_v31  ;;  %v652_v45 = vadd.f32 %v2692_v25, %v3262_v47  ;;  %v1918_v22 = vsel %vm1854_vm0, 1, %v3030_v56  ;;  %v1794_v31 = vld [vmem:[%s3278_s10 + $0x80] sm:$0xff] }
  0xee   : > { %v643_v32 = vpop.f32.mrf.mxu0  ;;  %v3346_v3 = vpop.f32.mrf.mxu1  ;;  %2010 = vperm.xlu1 %2950, %v1919_v21   ;;  %2007 = vperm.xlu0 %2949, %v1918_v22   ;;  %vm1858_vm4 = vcmp.gt.f32.partialorder %v1794_v31, 0.5 }
  0xef   : > { %v932_v36 = vpack.c.bf16 %v871_v29, %v870_v28  ;;  %v644_v42 = vadd.f32 %v3262_v47, %v643_v32  ;;  %v876_v61 = vmax.f32 %v652_v45, 0.0  ;;  %v1795_v29 = vld [vmem:[%s3278_s10 + $0x88] sm:$0xff]  ;;  %v1796_v45 = vld [vmem:[%s3278_s10 + $0x90] sm:$0xff] }
  0xf0   : > { %v2693_v39 = vpop.f32.mrf.mxu0  ;;  %v3352_v11 = vpop.f32.mrf.mxu1  ;;  %vm1859_vm3 = vcmp.gt.f32.partialorder %v1795_v29, 0.5  ;;  %vm1860_vm6 = vcmp.gt.f32.partialorder %v1796_v45, 0.5 }
  0xf1   : > { %v655_v43 = vadd.f32 %v2693_v39, %v3262_v47  ;;  %2766 = vmatprep.mubr.bf16.mxu1 %v932_v36  ;;  %v874_v58 = vmax.f32 %v644_v42, 0.0  ;;  %v1921_v36 = vsel %vm1857_vm1, 1, %v3030_v56  ;;  %v1924_v1 = vsel %vm1860_vm6, 1, %v3030_v56 }
  0xf2   : > { %v646_v46 = vpop.f32.mrf.mxu0  ;;  %2767 = vmatmul.mubr.bf16.gmra.mxu1 %v933_v38  ;;  %v3358_v18 = vpop.f32.mrf.mxu1  ;;  %v1920_v38 = vsel %vm1856_vm2, 1, %v3030_v56  ;;  %2016 = vperm.xlu1 %2950, %v1921_v36  }
  0xf3   : > { %v647_v51 = vadd.f32 %v3262_v47, %v646_v46  ;;  %v877_v53 = vmax.f32 %v655_v43, 0.0  ;;  %v1797_v43 = vld [vmem:[%s3278_s10 + $0x98] sm:$0xff]  ;;  %2013 = vperm.xlu0 %2949, %v1920_v38  }
  0xf4   : > { %v2696_v54 = vpop.f32.mrf.mxu0  ;;  %v3362_v26 = vpop.f32.mrf.mxu1  ;;  %vm1861_vm5 = vcmp.gt.f32.partialorder %v1797_v43, 0.5 }
  0xf5   : > { %v875_v59 = vmax.f32 %v647_v51, 0.0  ;;  %v935_v4 = vpack.c.bf16 %v877_v53, %v876_v61  ;;  %v668_v12 = vadd.f32 %v2696_v54, %v3262_v47  ;;  %v1923_v51 = vsel %vm1859_vm3, 1, %v3030_v56 }
  0xf6   : > { %v659_v62 = vpop.f32.mrf.mxu0  ;;  %v3366_v35 = vpop.f32.mrf.mxu1  ;;  %v1922_v53 = vsel %vm1858_vm4, 1, %v3030_v56  ;;  %2022 = vperm.xlu1 %2950, %v1923_v51   ;;  %v1925_v0 = vsel %vm1861_vm5, 1, %v3030_v56 }
  0xf7   : > { %v934_v2 = vpack.c.bf16 %v875_v59, %v874_v58  ;;  %v660_v8 = vadd.f32 %v3262_v47, %v659_v62  ;;  %v880_v27 = vmax.f32 %v668_v12, 0.0  ;;  %2019 = vperm.xlu0 %2949, %v1922_v53  }
  0xf8   : > { %v2697_v5 = vpop.f32.mrf.mxu0  ;;  %v3376_v50 = vpop.f32.mrf.mxu1 }
  0xf9   : > { %v671_v10 = vadd.f32 %v2697_v5, %v3262_v47  ;;  %2770 = vmatprep.mubr.bf16.mxu1 %v934_v2  ;;  %v878_v24 = vmax.f32 %v660_v8, 0.0 }
  0xfa   : > { %v662_v13 = vpop.f32.mrf.mxu0  ;;  %2771 = vmatmul.mubr.bf16.gmra.mxu1 %v935_v4  ;;  %v3380_v63 = vpop.f32.mrf.mxu1  ;;  %2028 = vperm.xlu1 %2950, %v1925_v0  }
  0xfb   : > { %v663_v17 = vadd.f32 %v3262_v47, %v662_v13  ;;  %v881_v19 = vmax.f32 %v671_v10, 0.0  ;;  %2025 = vperm.xlu0 %2949, %v1924_v1   ;;  %v756_v1 = vadd.f32 %v3262_v47, %v3326_v44 }
  0xfc   : > { %v2700_v20 = vpop.f32.mrf.mxu0  ;;  %v3388_v12 = vpop.f32.mrf.mxu1 }
  0xfd   : > { %v879_v25 = vmax.f32 %v663_v17, 0.0  ;;  %v937_v33 = vpack.c.bf16 %v881_v19, %v880_v27  ;;  %v684_v41 = vadd.f32 %v2700_v20, %v3262_v47 }
  0xfe   : > { %v675_v28 = vpop.f32.mrf.mxu0  ;;  %v3390_v22 = vpop.f32.mrf.mxu1 }
  0xff   : > { %v936_v32 = vpack.c.bf16 %v879_v25, %v878_v24  ;;  %v676_v39 = vadd.f32 %v3262_v47, %v675_v28  ;;  %v884_v57 = vmax.f32 %v684_v41, 0.0  ;;  %v740_v41 = vadd.f32 %v3262_v47, %v3300_v16 }
 0x100   : > { %v2701_v34 = vpop.f32.mrf.mxu0 }
 0x101   : > { %v687_v40 = vadd.f32 %v2701_v34, %v3262_v47  ;;  %2774 = vmatprep.mubr.bf16.mxu1 %v936_v32  ;;  %v882_v54 = vmax.f32 %v676_v39, 0.0 }
 0x102   : > { %v678_v42 = vpop.f32.mrf.mxu0  ;;  %2775 = vmatmul.mubr.bf16.gmra.mxu1 %v937_v33  ;;  %v3396_v33 = vpop.f32.mrf.mxu1 }
 0x103   : > { %v679_v46 = vadd.f32 %v3262_v47, %v678_v42  ;;  %v885_v48 = vmax.f32 %v687_v40, 0.0  ;;  %v743_v42 = vadd.f32 %v3262_v47, %v3313_v30 }
 0x104   : > { %v2704_v49 = vpop.f32.mrf.mxu0 }
 0x105   : > { %v883_v55 = vmax.f32 %v679_v46, 0.0  ;;  %v939_v61 = vpack.c.bf16 %v885_v48, %v884_v57  ;;  %v700_v5 = vadd.f32 %v2704_v49, %v3262_v47  ;;  %v3402_v46 = vpop.f32.mrf.mxu1  ;;  %v899_v16 = vmax.f32 %v743_v42, 0.0 }
 0x106   : > { %v691_v58 = vpop.f32.mrf.mxu0  ;;  %v783_v42 = vadd.f32 %v3358_v18, %v3262_v47 }
 0x107   : > { %v938_v59 = vpack.c.bf16 %v883_v55, %v882_v54  ;;  %v692_v2 = vadd.f32 %v3262_v47, %v691_v58  ;;  %v888_v15 = vmax.f32 %v700_v5, 0.0  ;;  %v898_v54 = vmax.f32 %v740_v41, 0.0  ;;  %v3408_v58 = vpop.f32.mrf.mxu1 }
 0x108   : > { %v2705_v62 = vpop.f32.mrf.mxu0  ;;  %v780_v41 = vadd.f32 %v3346_v3, %v3262_v47 }
 0x109   : > { %v703_v4 = vadd.f32 %v2705_v62, %v3262_v47  ;;  %2778 = vmatprep.mubr.bf16.mxu1 %v938_v59  ;;  %v886_v13 = vmax.f32 %v692_v2, 0.0  ;;  %v946_v0 = vpack.c.bf16 %v899_v16, %v898_v54  ;;  %v759_v2 = vadd.f32 %v3262_v47, %v3339_v60  ;;  %v1804_v16 = vld [vmem:[%s3278_s10 + $0xd0] sm:$0xff] }
 0x10a   : > { %v694_v6 = vpop.f32.mrf.mxu0  ;;  %2779 = vmatmul.mubr.bf16.gmra.mxu1 %v939_v61  ;;  %v775_v60 = vadd.f32 %v3262_v47, %v3362_v26  ;;  %vm1868_vm14 = vcmp.gt.f32.partialorder %v1804_v16, 0.5 }
 0x10b   : > { %v695_v7 = vadd.f32 %v3262_v47, %v694_v6  ;;  %v889_v8 = vmax.f32 %v703_v4, 0.0  ;;  %v748_v4 = vadd.f32 %v3294_v9, %v3262_v47  ;;  %v751_v6 = vadd.f32 %v3309_v23, %v3262_v47 }
 0x10c   : > { %v2708_v10 = vpop.f32.mrf.mxu0  ;;  %v772_v9 = vadd.f32 %v3262_v47, %v3352_v11  ;;  %v907_v11 = vmax.f32 %v775_v60, 0.0 }
 0x10d   : > { %v887_v14 = vmax.f32 %v695_v7, 0.0  ;;  %v941_v20 = vpack.c.bf16 %v889_v8, %v888_v15  ;;  %v716_v27 = vadd.f32 %v2708_v10, %v3262_v47  ;;  %v3418_v7 = vpop.f32.mrf.mxu1  ;;  %v902_v8 = vmax.f32 %v756_v1, 0.0 }
 0x10e   : > { %v707_v17 = vpop.f32.mrf.mxu0  ;;  %v903_v10 = vmax.f32 %v759_v2, 0.0  ;;  %v900_v44 = vmax.f32 %v748_v4, 0.0  ;;  %v796_v1 = vadd.f32 %v3366_v35, %v3262_v47  ;;  %v799_v2 = vadd.f32 %v3380_v63, %v3262_v47 }
 0x10f   : > { %v940_v19 = vpack.c.bf16 %v887_v14, %v886_v13  ;;  %v708_v24 = vadd.f32 %v3262_v47, %v707_v17  ;;  %v892_v38 = vmax.f32 %v716_v27, 0.0  ;;  %v901_v13 = vmax.f32 %v751_v6, 0.0  ;;  %v3420_v14 = vpop.f32.mrf.mxu1 }
 0x110   : > { %v2709_v21 = vpop.f32.mrf.mxu0  ;;  %v948_v23 = vpack.c.bf16 %v903_v10, %v902_v8  ;;  %v764_v17 = vadd.f32 %v3320_v37, %v3262_v47  ;;  %v912_v10 = vmax.f32 %v796_v1, 0.0  ;;  %v913_v63 = vmax.f32 %v799_v2, 0.0  ;;  %v1819_v2 = vld [vmem:[%s3278_s10 + $0x148] sm:$0xff] }
 0x111   : > { %v719_v25 = vadd.f32 %v2709_v21, %v3262_v47  ;;  %2782 = vmatprep.mubr.bf16.mxu1 %v940_v19  ;;  %v890_v34 = vmax.f32 %v708_v24, 0.0  ;;  %v947_v15 = vpack.c.bf16 %v901_v13, %v900_v44  ;;  %v767_v19 = vadd.f32 %v3335_v52, %v3262_v47  ;;  %v1799_v21 = vld [vmem:[%s3278_s10 + $0xa8] sm:$0xff]  ;;  %v1798_v24 = vld [vmem:[%s3278_s10 + $0xa0] sm:$0xff]  ;;  %v1801_v52 = vld [vmem:[%s3278_s10 + $0xb8] sm:$0xff] }
 0x112   : > { %v710_v28 = vpop.f32.mrf.mxu0  ;;  %2783 = vmatmul.mubr.bf16.gmra.mxu1 %v941_v20  ;;  %v3430_v20 = vpop.f32.mrf.mxu1  ;;  %vm1863_vm7 = vcmp.gt.f32.partialorder %v1799_v21, 0.5  ;;  %vm1862_vm8 = vcmp.gt.f32.partialorder %v1798_v24, 0.5  ;;  %v904_v37 = vmax.f32 %v764_v17, 0.0  ;;  %vm1865_vm9 = vcmp.gt.f32.partialorder %v1801_v52, 0.5  ;;  %v1809_v13 = vld [vmem:[%s3278_s10 + $0xf8] sm:$0xff] }
 0x113   : > { %v711_v29 = vadd.f32 %v3262_v47, %v710_v28  ;;  %v893_v31 = vmax.f32 %v719_v25, 0.0  ;;  %v906_v25 = vmax.f32 %v772_v9, 0.0  ;;  %v1927_v26 = vsel %vm1863_vm7, 1, %v3030_v56  ;;  %v1808_v9 = vld [vmem:[%s3278_s10 + $0xf0] sm:$0xff] }
 0x114   : > { %v2712_v32 = vpop.f32.mrf.mxu0  ;;  %v1926_v27 = vsel %vm1862_vm8, 1, %v3030_v56  ;;  %v905_v28 = vmax.f32 %v767_v19, 0.0  ;;  %2034 = vperm.xlu1 %2950, %v1927_v26   ;;  %vm1873_vm1 = vcmp.gt.f32.partialorder %v1809_v13, 0.5  ;;  %vm1872_vm2 = vcmp.gt.f32.partialorder %v1808_v9, 0.5  ;;  %v1810_v26 = vld [vmem:[%s3278_s10 + $0x100] sm:$0xff] }
 0x115   : > { %v891_v36 = vmax.f32 %v711_v29, 0.0  ;;  %v943_v43 = vpack.c.bf16 %v893_v31, %v892_v38  ;;  %v732_v51 = vadd.f32 %v2712_v32, %v3262_v47  ;;  %v3436_v29 = vpop.f32.mrf.mxu1  ;;  %2031 = vperm.xlu0 %2949, %v1926_v27   ;;  %v1800_v31 = vld [vmem:[%s3278_s10 + $0xb0] sm:$0xff]  ;;  %v950_v32 = vpack.c.bf16 %v907_v11, %v906_v25 }
 0x116   : > { %v723_v39 = vpop.f32.mrf.mxu0  ;;  %vm1864_vm10 = vcmp.gt.f32.partialorder %v1800_v31, 0.5  ;;  %v1929_v38 = vsel %vm1865_vm9, 1, %v3030_v56  ;;  %v1937_v17 = vsel %vm1873_vm1, 1, %v3030_v56  ;;  %v1936_v19 = vsel %vm1872_vm2, 1, %v3030_v56  ;;  %v1813_v31 = vld [vmem:[%s3278_s10 + $0x118] sm:$0xff] }
 0x117   : > { %v942_v40 = vpack.c.bf16 %v891_v36, %v890_v34  ;;  %v724_v48 = vadd.f32 %v3262_v47, %v723_v39  ;;  %v896_v61 = vmax.f32 %v732_v51, 0.0  ;;  %v788_v34 = vadd.f32 %v3262_v47, %v3376_v50  ;;  %v1802_v50 = vld [vmem:[%s3278_s10 + $0xc0] sm:$0xff] }
 0x118   : > { %v2713_v45 = vpop.f32.mrf.mxu0  ;;  %v791_v36 = vadd.f32 %v3262_v47, %v3388_v12  ;;  %v1928_v39 = vsel %vm1864_vm10, 1, %v3030_v56  ;;  %2040 = vperm.xlu1 %2950, %v1929_v38   ;;  %v2966_v12 = vld [vmem:[%s3959_s6] sm:$0xff]   ;;  %vm1866_vm12 = vcmp.gt.f32.partialorder %v1802_v50, 0.5  ;;  %v908_v51 = vmax.f32 %v780_v41, 0.0 }
 0x119   : > { %v735_v49 = vadd.f32 %v2713_v45, %v3262_v47  ;;  %2786 = vmatprep.mubr.bf16.mxu1 %v942_v40  ;;  %v894_v30 = vmax.f32 %v724_v48, 0.0  ;;  %v949_v40 = vpack.c.bf16 %v905_v28, %v904_v37  ;;  %2037 = vperm.xlu0 %2949, %v1928_v39   ;;  %v1803_v45 = vld [vmem:[%s3278_s10 + $0xc8] sm:$0xff]  ;;  %v910_v48 = vmax.f32 %v788_v34, 0.0 }
 0x11a   : > { %v726_v53 = vpop.f32.mrf.mxu0  ;;  %2787 = vmatmul.mubr.bf16.gmra.mxu1 %v943_v43  ;;  %v3450_v43 = vpop.f32.mrf.mxu1  ;;  %vm1867_vm11 = vcmp.gt.f32.partialorder %v1803_v45, 0.5  ;;  %v911_v3 = vmax.f32 %v791_v36, 0.0  ;;  %2840 = vmatprep.subr.bf16.mxu0 %v2966_v12  ;;  %v953_v21 = vpack.c.bf16 %v913_v63, %v912_v10  ;;  %v812_v24 = vadd.f32 %v3390_v22, %v3262_v47  ;;  %v1820_v10 = vld [vmem:[%s3278_s10 + $0x150] sm:$0xff] }
 0x11b   : > { %v727_v55 = vadd.f32 %v3262_v47, %v726_v53  ;;  %v897_v57 = vmax.f32 %v735_v49, 0.0  ;;  %v1931_v18 = vsel %vm1867_vm11, 1, %v3030_v56  ;;  %v1930_v49 = vsel %vm1866_vm12, 1, %v3030_v56  ;;  %2841 = vmatpush3.bf16.msra.mxu0 %v2966_v12  ;;  %v1815_v12 = vld [vmem:[%s3278_s10 + $0x128] sm:$0xff] }
 0x11c   : > { %v909_v53 = vmax.f32 %v783_v42, 0.0  ;;  %v3459_v54 = vpop.f32.mrf.mxu1  ;;  %2046 = vperm.xlu1 %2950, %v1931_v18   ;;  %v815_v25 = vadd.f32 %v3402_v46, %v3262_v47  ;;  %vm1874_vm4 = vcmp.gt.f32.partialorder %v1810_v26, 0.5  ;;  %vm1877_vm5 = vcmp.gt.f32.partialorder %v1813_v31, 0.5 }
 0x11d   : > { %v895_v59 = vmax.f32 %v727_v55, 0.0  ;;  %v945_v5 = vpack.c.bf16 %v897_v57, %v896_v61  ;;  %2043 = vperm.xlu0 %2949, %v1930_v49   ;;  %v1805_v55 = vld [vmem:[%s3278_s10 + $0xd8] sm:$0xff]  ;;  %v804_v57 = vadd.f32 %v3262_v47, %v3396_v33  ;;  %v1807_v33 = vld [vmem:[%s3278_s10 + $0xe8] sm:$0xff]  ;;  %v1938_v22 = vsel %vm1874_vm4, 1, %v3030_v56 }
 0x11e   : > { %vm1869_vm13 = vcmp.gt.f32.partialorder %v1805_v55, 0.5  ;;  %v3473_v4 = vpop.f32.mrf.mxu1  ;;  %vm1871_vm15 = vcmp.gt.f32.partialorder %v1807_v33, 0.5  ;;  %v917_v46 = vmax.f32 %v815_v25, 0.0  ;;  %v836_v34 = vadd.f32 %v3262_v47, %v3459_v54  ;;  %v1817_v54 = vld [vmem:[%s3278_s10 + $0x138] sm:$0xff]  ;;  %v1816_v55 = vld [vmem:[%s3278_s10 + $0x130] sm:$0xff]  ;;  %v1818_v33 = vld [vmem:[%s3278_s10 + $0x140] sm:$0xff] }
 0x11f   : > { %v944_v62 = vpack.c.bf16 %v895_v59, %v894_v30  ;;  %v807_v30 = vadd.f32 %v3262_v47, %v3408_v58  ;;  %v952_v59 = vpack.c.bf16 %v911_v3, %v910_v48  ;;  %v1933_v61 = vsel %vm1869_vm13, 1, %v3030_v56  ;;  %v1806_v58 = vld [vmem:[%s3278_s10 + $0xe0] sm:$0xff] }
 0x120   : > { %2052 = vperm.xlu1 %2950, %v1933_v61   ;;  %vm1870_vm0 = vcmp.gt.f32.partialorder %v1806_v58, 0.5  ;;  %v1935_v8 = vsel %vm1871_vm15, 1, %v3030_v56  ;;  %v838_v44 = vpop.f32.mrf.mxu1  ;;  %v1941_v39 = vsel %vm1877_vm5, 1, %v3030_v56  ;;  %v828_v42 = vadd.f32 %v3418_v7, %v3262_v47  ;;  %v1814_v48 = vld [vmem:[%s3278_s10 + $0x120] sm:$0xff] }
 0x121   : > { %2790 = vmatprep.mubr.bf16.mxu1 %v944_v62  ;;  %v1932_v62 = vsel %vm1868_vm14, 1, %v3030_v56  ;;  %v915_v6 = vmax.f32 %v807_v30, 0.0  ;;  %v1934_v35 = vsel %vm1870_vm0, 1, %v3030_v56  ;;  %v839_v36 = vadd.f32 %v3262_v47, %v838_v44 }
 0x122   : > { %2791 = vmatmul.mubr.bf16.gmra.mxu1 %v945_v5  ;;  %2049 = vperm.xlu0 %2949, %v1932_v62   ;;  %v914_v5 = vmax.f32 %v804_v57, 0.0  ;;  %v3491_v11 = vpop.f32.mrf.mxu1  ;;  %v831_v45 = vadd.f32 %v3430_v20, %v3262_v47  ;;  %v922_v3 = vmax.f32 %v836_v34, 0.0  ;;  %vm1879_vm7 = vcmp.gt.f32.partialorder %v1815_v12, 0.5  ;;  %v1831_v34 = vld [vmem:[%s3278_s10 + $0x1a8] sm:$0xff]  ;;  %v1834_v12 = vld [vmem:[%s3278_s10 + $0x1c0] sm:$0xff] }
 0x123   : > { %2794 = vmatprep.mubr.bf16.mxu1 %v946_v0  ;;  %v951_v0 = vpack.c.bf16 %v909_v53, %v908_v51  ;;  %v923_v18 = vmax.f32 %v839_v36, 0.0  ;;  %vm1878_vm8 = vcmp.gt.f32.partialorder %v1814_v48, 0.5  ;;  %v1943_v49 = vsel %vm1879_vm7, 1, %v3030_v56  ;;  %v1830_v36 = vld [vmem:[%s3278_s10 + $0x1a0] sm:$0xff] }
 0x124   : > { %2058 = vperm.xlu1 %2950, %v1935_v8   ;;  %v954_v60 = vpack.c.bf16 %v915_v6, %v914_v5  ;;  %v851_v52 = vpop.f32.mrf.mxu1  ;;  %v1942_v7 = vsel %vm1878_vm8, 1, %v3030_v56  ;;  %v920_v51 = vmax.f32 %v828_v42, 0.0  ;;  %v921_v53 = vmax.f32 %v831_v45, 0.0 }
 0x125   : > { %v958_v16 = vpack.c.bf16 %v923_v18, %v922_v3  ;;  %vm1881_vm9 = vcmp.gt.f32.partialorder %v1817_v54, 0.5  ;;  %vm1880_vm10 = vcmp.gt.f32.partialorder %v1816_v55, 0.5  ;;  %v852_v57 = vadd.f32 %v3262_v47, %v851_v52  ;;  %v1828_v52 = vld [vmem:[%s3278_s10 + $0x190] sm:$0xff]  ;;  %v1837_v18 = vld [vmem:[%s3278_s10 + $0x1d8] sm:$0xff] }
 0x126   : > { %2055 = vperm.xlu0 %2949, %v1934_v35   ;;  %v2745_v50 = vpop.f32.mrf.mxu1  ;;  %v1944_v61 = vsel %vm1880_vm10, 1, %v3030_v56  ;;  %v957_v62 = vpack.c.bf16 %v921_v53, %v920_v51  ;;  %v847_v1 = vadd.f32 %v3473_v4, %v3262_v47  ;;  %vm1883_vm11 = vcmp.gt.f32.partialorder %v1819_v2, 0.5  ;;  %v1821_v4 = vld [vmem:[%s3278_s10 + $0x158] sm:$0xff]  ;;  %v1839_v53 = vld [vmem:[%s3278_s10 + $0x1e8] sm:$0xff] }
 0x127   : > { %vm1882_vm12 = vcmp.gt.f32.partialorder %v1818_v33, 0.5  ;;  %v926_v58 = vmax.f32 %v852_v57, 0.0  ;;  %v1947_v6 = vsel %vm1883_vm11, 1, %v3030_v56  ;;  %vm1885_vm13 = vcmp.gt.f32.partialorder %v1821_v4, 0.5  ;;  %v1840_v57 = vld [vmem:[%s3278_s10 + $0x1f0] sm:$0xff] }
 0x128   : > { %2064 = vperm.xlu1 %2950, %v1937_v17   ;;  %v854_v20 = vpop.f32.mrf.mxu1  ;;  %v1946_v8 = vsel %vm1882_vm12, 1, %v3030_v56  ;;  %v925_v35 = vmax.f32 %v847_v1, 0.0  ;;  %vm1884_vm14 = vcmp.gt.f32.partialorder %v1820_v10, 0.5  ;;  %v1949_v44 = vsel %vm1885_vm13, 1, %v3030_v56  ;;  %v1822_v17 = vld [vmem:[%s3278_s10 + $0x160] sm:$0xff] }
 0x129   : > { %v855_v30 = vadd.f32 %v3262_v47, %v854_v20  ;;  %v1948_v13 = vsel %vm1884_vm14, 1, %v3030_v56  ;;  %vm1886_vm0 = vcmp.gt.f32.partialorder %v1822_v17, 0.5  ;;  %vm1895_vm7 = vcmp.gt.f32.partialorder %v1831_v34, 0.5  ;;  %v1838_v20 = vld [vmem:[%s3278_s10 + $0x1e0] sm:$0xff] }
 0x12a   : > { %2795 = vmatmul.mubr.bf16.gmra.mxu1 %v947_v15  ;;  %v823_v15 = vadd.f32 %v3262_v47, %v3436_v29  ;;  %2061 = vperm.xlu0 %2949, %v1936_v19   ;;  %v916_v29 = vmax.f32 %v812_v24, 0.0  ;;  %vm1894_vm8 = vcmp.gt.f32.partialorder %v1830_v36, 0.5  ;;  %vm1898_vm12 = vcmp.gt.f32.partialorder %v1834_v12, 0.5 }
 0x12b   : > { %2798 = vmatprep.mubr.bf16.mxu1 %v948_v23  ;;  %v820_v23 = vadd.f32 %v3262_v47, %v3420_v14  ;;  %v1811_v14 = vld [vmem:[%s3278_s10 + $0x108] sm:$0xff]  ;;  %v927_v5 = vmax.f32 %v855_v30, 0.0  ;;  %v1962_v3 = vsel %vm1898_vm12, 1, %v3030_v56  ;;  %vm1901_vm13 = vcmp.gt.f32.partialorder %v1837_v18, 0.5 }
 0x12c   : > { %vm1875_vm3 = vcmp.gt.f32.partialorder %v1811_v14, 0.5  ;;  %v919_v37 = vmax.f32 %v823_v15, 0.0  ;;  %v955_v41 = vpack.c.bf16 %v917_v46, %v916_v29  ;;  %v1823_v15 = vld [vmem:[%s3278_s10 + $0x168] sm:$0xff]  ;;  %v1829_v46 = vld [vmem:[%s3278_s10 + $0x198] sm:$0xff] }
 0x12d   : > { %v918_v27 = vmax.f32 %v820_v23, 0.0  ;;  %v1939_v28 = vsel %vm1875_vm3, 1, %v3030_v56  ;;  %v960_v63 = vpack.c.bf16 %v927_v5, %v926_v58  ;;  %v863_v23 = vadd.f32 %v2745_v50, %v3262_v47  ;;  %v1835_v50 = vld [vmem:[%s3278_s10 + $0x1c8] sm:$0xff] }
 0x12e   : > { %2070 = vperm.xlu1 %2950, %v1939_v28   ;;  %2067 = vperm.xlu0 %2949, %v1938_v22   ;;  %vm1887_vm15 = vcmp.gt.f32.partialorder %v1823_v15, 0.5  ;;  %v1826_v28 = vld [vmem:[%s3278_s10 + $0x180] sm:$0xff]  ;;  %vm1893_vm5 = vcmp.gt.f32.partialorder %v1829_v46, 0.5  ;;  %vm1899_vm11 = vcmp.gt.f32.partialorder %v1835_v50, 0.5 }
 0x12f   : > { %v956_v38 = vpack.c.bf16 %v919_v37, %v918_v27  ;;  %v1951_v19 = vsel %vm1887_vm15, 1, %v3030_v56  ;;  %v929_v25 = vmax.f32 %v863_v23, 0.0  ;;  %v1827_v37 = vld [vmem:[%s3278_s10 + $0x188] sm:$0xff]  ;;  %vm1890_vm4 = vcmp.gt.f32.partialorder %v1826_v28, 0.5 }
 0x130   : > { %vm1891_vm3 = vcmp.gt.f32.partialorder %v1827_v37, 0.5  ;;  %v1954_v29 = vsel %vm1890_vm4, 1, %v3030_v56  ;;  %v1957_v31 = vsel %vm1893_vm5, 1, %v3030_v56  ;;  %v1963_v48 = vsel %vm1899_vm11, 1, %v3030_v56 }
 0x131   : > { %v1955_v22 = vsel %vm1891_vm3, 1, %v3030_v56  ;;  %vm1903_vm15 = vcmp.gt.f32.partialorder %v1839_v53, 0.5 }
 0x132   : > { %2799 = vmatmul.mubr.bf16.gmra.mxu1 %v949_v40  ;;  %2076 = vperm.xlu1 %2950, %v1941_v39   ;;  %v1958_v39 = vsel %vm1894_vm8, 1, %v3030_v56  ;;  %v1967_v54 = vsel %vm1903_vm15, 1, %v3030_v56 }
 0x133   : > { %2802 = vmatprep.mubr.bf16.mxu1 %v950_v32  ;;  %v1812_v32 = vld [vmem:[%s3278_s10 + $0x110] sm:$0xff] }
 0x134   : > { %vm1876_vm6 = vcmp.gt.f32.partialorder %v1812_v32, 0.5 }
 0x135   : > { %v1940_v40 = vsel %vm1876_vm6, 1, %v3030_v56  ;;  %vm1892_vm6 = vcmp.gt.f32.partialorder %v1828_v52, 0.5 }
 0x136   : > { %2073 = vperm.xlu0 %2949, %v1940_v40   ;;  %2082 = vperm.xlu1 %2950, %v1943_v49   ;;  %v1956_v32 = vsel %vm1892_vm6, 1, %v3030_v56  ;;  %v1833_v40 = vld [vmem:[%s3278_s10 + $0x1b8] sm:$0xff]  ;;  %v1836_v49 = vld [vmem:[%s3278_s10 + $0x1d0] sm:$0xff] }
 0x137   : > { %vm1900_vm14 = vcmp.gt.f32.partialorder %v1836_v49, 0.5 }
 0x138   : > { %v1964_v51 = vsel %vm1900_vm14, 1, %v3030_v56 }
 0x13a   : > { %2803 = vmatmul.mubr.bf16.gmra.mxu1 %v951_v0  ;;  %2079 = vperm.xlu0 %2949, %v1942_v7   ;;  %v844_v0 = vadd.f32 %v3450_v43, %v3262_v47  ;;  %v1965_v7 = vsel %vm1901_vm13, 1, %v3030_v56 }
 0x13b   : > { %2806 = vmatprep.mubr.bf16.mxu1 %v952_v59  ;;  %v1945_v59 = vsel %vm1881_vm9, 1, %v3030_v56  ;;  %vm1897_vm9 = vcmp.gt.f32.partialorder %v1833_v40, 0.5 }
 0x13c   : > { %2088 = vperm.xlu1 %2950, %v1945_v59   ;;  %v924_v43 = vmax.f32 %v844_v0, 0.0  ;;  %v1961_v42 = vsel %vm1897_vm9, 1, %v3030_v56  ;;  %v3576_v0 = vld [vmem:[%s3958_s5] ss:$0 sm:$0xff] }
 0x13e   : > { %2085 = vperm.xlu0 %2949, %v1944_v61   ;;  %v959_v9 = vpack.c.bf16 %v925_v35, %v924_v43 }
 0x140   : > { %2094 = vperm.xlu1 %2950, %v1947_v6  }
 0x142   : > { %2807 = vmatmul.mubr.bf16.gmra.mxu1 %v953_v21  ;;  %2091 = vperm.xlu0 %2949, %v1946_v8   ;;  %v1950_v21 = vsel %vm1886_vm0, 1, %v3030_v56  ;;  %vm1902_vm0 = vcmp.gt.f32.partialorder %v1838_v20, 0.5 }
 0x143   : > { %2810 = vmatprep.mubr.bf16.mxu1 %v954_v60  ;;  %v860_v60 = vadd.f32 %v3491_v11, %v3262_v47  ;;  %v1825_v47 = vld [vmem:[%s3278_s10 + $0x178] sm:$0xff]  ;;  %v1824_v11 = vld [vmem:[%s3278_s10 + $0x170] sm:$0xff]  ;;  %v1966_v55 = vsel %vm1902_vm0, 1, %v3030_v56 }
 0x144   : > { %2100 = vperm.xlu1 %2950, %v1949_v44   ;;  %vm1889_vm1 = vcmp.gt.f32.partialorder %v1825_v47, 0.5  ;;  %vm1888_vm2 = vcmp.gt.f32.partialorder %v1824_v11, 0.5 }
 0x145   : > { %v928_v24 = vmax.f32 %v860_v60, 0.0  ;;  %v1953_v14 = vsel %vm1889_vm1, 1, %v3030_v56  ;;  %v1952_v26 = vsel %vm1888_vm2, 1, %v3030_v56  ;;  %vm1904_vm2 = vcmp.gt.f32.partialorder %v1840_v57, 0.5 }
 0x146   : > { %2097 = vperm.xlu0 %2949, %v1948_v13   ;;  %v1968_v59 = vsel %vm1904_vm2, 1, %v3030_v56 }
 0x147   : > { %v961_v27 = vpack.c.bf16 %v929_v25, %v928_v24 }
 0x148   : > { %2106 = vperm.xlu1 %2950, %v1951_v19  }
 0x14a   : > { %2811 = vmatmul.mubr.bf16.gmra.mxu1 %v955_v41  ;;  %2103 = vperm.xlu0 %2949, %v1950_v21   ;;  %v1832_v41 = vld [vmem:[%s3278_s10 + $0x1b0] sm:$0xff] }
 0x14b   : > { %2814 = vmatprep.mubr.bf16.mxu1 %v956_v38  ;;  %v1959_v38 = vsel %vm1895_vm7, 1, %v3030_v56  ;;  %vm1896_vm10 = vcmp.gt.f32.partialorder %v1832_v41, 0.5 }
 0x14c   : > { %2112 = vperm.xlu1 %2950, %v1953_v14   ;;  %v1960_v45 = vsel %vm1896_vm10, 1, %v3030_v56 }
 0x14e   : > { %2109 = vperm.xlu0 %2949, %v1952_v26  }
 0x150   : > { %2118 = vperm.xlu1 %2950, %v1955_v22  }
 0x152   : > { %2815 = vmatmul.mubr.bf16.gmra.mxu1 %v957_v62  ;;  %2115 = vperm.xlu0 %2949, %v1954_v29  }
 0x153   : > { %2818 = vmatprep.mubr.bf16.mxu1 %v958_v16  ;;  %v1841_v16 = vld [vmem:[%s3278_s10 + $0x1f8] sm:$0xff]  ;;  %s2973_s10 = scalar_lea.vmem %s2972_s9, 256 }
 0x154   : > { %2124 = vperm.xlu1 %2950, %v1957_v31   ;;  %vm1905_vm1 = vcmp.gt.f32.partialorder %v1841_v16, 0.5  ;;  %p2975_p1 = scmp.lt.s32.totalorder %s2973_s10, %s2967_s19 }
 0x155   : > { %v1969_v30 = vsel %vm1905_vm1, 1, %v3030_v56 }
 0x156   : > { %2121 = vperm.xlu0 %2949, %v1956_v32   ;;  %p2976_p2 = por %p2975_p1, %p2974_p0 }
 0x158   : > { %2130 = vperm.xlu1 %2950, %v1959_v38   ;;  %p2977_p3 = pnand %p2976_p2, %p2970_p13 }
 0x15a   : > { %2819 = vmatmul.mubr.bf16.gmra.mxu1 %v959_v9  ;;  %2127 = vperm.xlu0 %2949, %v1958_v39  }
 0x15b   : > { %2822 = vmatprep.mubr.bf16.mxu1 %v960_v63 }
 0x15c   : > { %2136 = vperm.xlu1 %2950, %v1961_v42  }
 0x15e   : > { %2133 = vperm.xlu0 %2949, %v1960_v45  }
 0x160   : > { %2142 = vperm.xlu1 %2950, %v1963_v48  }
 0x162   : > { %2823 = vmatmul.mubr.bf16.gmra.mxu1 %v961_v27  ;;  %2139 = vperm.xlu0 %2949, %v1962_v3  }
 0x164   : > { %2148 = vperm.xlu1 %2950, %v1965_v7  }
 0x166   : > { %2145 = vperm.xlu0 %2949, %v1964_v51  }
 0x168   : > { %2154 = vperm.xlu1 %2950, %v1967_v54  }
 0x16a   : > { %2151 = vperm.xlu0 %2949, %v1966_v55  }
 0x16c   : > { %2160 = vperm.xlu1 %2950, %v1969_v30  }
 0x16e   : > { %2157 = vperm.xlu0 %2949, %v1968_v59  }
 0x1aa   : > { %v2764_v61 = vpop.f32.mrf.mxu1 }
 0x1ab   : > { %v1076_v58 = vadd.f32 %v2764_v61, %v3576_v0 }
 0x1ac   : > { %v1067_v62 = vpop.f32.mrf.mxu1 }
 0x1ad   : > { %v1068_v2 = vadd.f32 %v3576_v0, %v1067_v62  ;;  %v1324_v4 = vmax.f32 %v1076_v58, 0.0 }
 0x1ae   : > { %v2765_v1 = vpop.f32.mrf.mxu1 }
 0x1af   : > { %v1079_v33 = vadd.f32 %v2765_v1, %v3576_v0  ;;  %v1322_v43 = vmax.f32 %v1068_v2, 0.0 }
 0x1b0   : > { %v1070_v5 = vpop.f32.mrf.mxu1 }
 0x1b1   : > { %v1071_v6 = vadd.f32 %v3576_v0, %v1070_v5  ;;  %v1325_v56 = vmax.f32 %v1079_v33, 0.0 }
 0x1b2   : > { %v2768_v8 = vpop.f32.mrf.mxu1 }
 0x1b3   : > { %v1323_v35 = vmax.f32 %v1071_v6, 0.0  ;;  %v1387_v44 = vpack.c.bf16 %v1325_v56, %v1324_v4  ;;  %v1092_v23 = vadd.f32 %v2768_v8, %v3576_v0 }
 0x1b4   : > { %v1083_v10 = vpop.f32.mrf.mxu1 }
 0x1b5   : > { %v1386_v63 = vpack.c.bf16 %v1323_v35, %v1322_v43  ;;  %v1084_v9 = vadd.f32 %v3576_v0, %v1083_v10  ;;  %v1328_v47 = vmax.f32 %v1092_v23, 0.0 }
 0x1b6   : > { %v2769_v13 = vpop.f32.mrf.mxu1 }
 0x1b7   : > { %v1095_v60 = vadd.f32 %v2769_v13, %v3576_v0  ;;  %2842 = vmatprep.mubr.bf16.mxu0 %v1386_v63  ;;  %v1326_v24 = vmax.f32 %v1084_v9, 0.0 }
 0x1b8   : > { %v1086_v15 = vpop.f32.mrf.mxu1  ;;  %2843 = vmatmul.mubr.bf16.vlgmr.msra.gmra.mxu0 %v1387_v44 }
 0x1b9   : > { %v1087_v17 = vadd.f32 %v3576_v0, %v1086_v15  ;;  %v1329_v19 = vmax.f32 %v1095_v60, 0.0 }
 0x1ba   : > { %v2772_v21 = vpop.f32.mrf.mxu1 }
 0x1bb   : > { %v1327_v25 = vmax.f32 %v1087_v17, 0.0  ;;  %v1389_v26 = vpack.c.bf16 %v1329_v19, %v1328_v47  ;;  %v1108_v22 = vadd.f32 %v2772_v21, %v3576_v0 }
 0x1bc   : > { %v1099_v11 = vpop.f32.mrf.mxu1 }
 0x1bd   : > { %v1388_v14 = vpack.c.bf16 %v1327_v25, %v1326_v24  ;;  %v1100_v37 = vadd.f32 %v3576_v0, %v1099_v11  ;;  %v1332_v36 = vmax.f32 %v1108_v22, 0.0 }
 0x1be   : > { %v2773_v27 = vpop.f32.mrf.mxu1 }
 0x1bf   : > { %v1111_v28 = vadd.f32 %v2773_v27, %v3576_v0  ;;  %2846 = vmatprep.mubr.bf16.mxu0 %v1388_v14  ;;  %v1330_v32 = vmax.f32 %v1100_v37, 0.0 }
 0x1c0   : > { %v1102_v29 = vpop.f32.mrf.mxu1  ;;  %2847 = vmatmul.mubr.bf16.gmra.mxu0 %v1389_v26 }
 0x1c1   : > { %v1103_v46 = vadd.f32 %v3576_v0, %v1102_v29  ;;  %v1333_v52 = vmax.f32 %v1111_v28, 0.0 }
 0x1c2   : > { %v2776_v31 = vpop.f32.mrf.mxu1 }
 0x1c3   : > { %v1331_v34 = vmax.f32 %v1103_v46, 0.0  ;;  %v1391_v40 = vpack.c.bf16 %v1333_v52, %v1332_v36  ;;  %v1124_v50 = vadd.f32 %v2776_v31, %v3576_v0 }
 0x1c4   : > { %v1115_v38 = vpop.f32.mrf.mxu1 }
 0x1c5   : > { %v1390_v39 = vpack.c.bf16 %v1331_v34, %v1330_v32  ;;  %v1116_v42 = vadd.f32 %v3576_v0, %v1115_v38  ;;  %v1336_v51 = vmax.f32 %v1124_v50, 0.0 }
 0x1c6   : > { %v2777_v41 = vpop.f32.mrf.mxu1 }
 0x1c7   : > { %v1127_v45 = vadd.f32 %v2777_v41, %v3576_v0  ;;  %2850 = vmatprep.mubr.bf16.mxu0 %v1390_v39  ;;  %v1334_v49 = vmax.f32 %v1116_v42, 0.0 }
 0x1c8   : > { %v1118_v12 = vpop.f32.mrf.mxu1  ;;  %2851 = vmatmul.mubr.bf16.gmra.mxu0 %v1391_v40 }
 0x1c9   : > { %v1119_v48 = vadd.f32 %v3576_v0, %v1118_v12  ;;  %v1337_v3 = vmax.f32 %v1127_v45, 0.0 }
 0x1ca   : > { %v2780_v18 = vpop.f32.mrf.mxu1 }
 0x1cb   : > { %v1335_v7 = vmax.f32 %v1119_v48, 0.0  ;;  %v1393_v54 = vpack.c.bf16 %v1337_v3, %v1336_v51  ;;  %v1140_v30 = vadd.f32 %v2780_v18, %v3576_v0 }
 0x1cc   : > { %v1131_v53 = vpop.f32.mrf.mxu1 }
 0x1cd   : > { %v1392_v20 = vpack.c.bf16 %v1335_v7, %v1334_v49  ;;  %v1132_v16 = vadd.f32 %v3576_v0, %v1131_v53  ;;  %v1340_v58 = vmax.f32 %v1140_v30, 0.0 }
 0x1ce   : > { %v2781_v55 = vpop.f32.mrf.mxu1 }
 0x1cf   : > { %v1143_v57 = vadd.f32 %v2781_v55, %v3576_v0  ;;  %2854 = vmatprep.mubr.bf16.mxu0 %v1392_v20  ;;  %v1338_v2 = vmax.f32 %v1132_v16, 0.0 }
 0x1d0   : > { %v1134_v59 = vpop.f32.mrf.mxu1  ;;  %2855 = vmatmul.mubr.bf16.gmra.mxu0 %v1393_v54 }
 0x1d1   : > { %v1135_v61 = vadd.f32 %v3576_v0, %v1134_v59  ;;  %v1341_v62 = vmax.f32 %v1143_v57, 0.0 }
 0x1d2   : > { %v2784_v1 = vpop.f32.mrf.mxu1 }
 0x1d3   : > { %v1339_v33 = vmax.f32 %v1135_v61, 0.0  ;;  %v1395_v56 = vpack.c.bf16 %v1341_v62, %v1340_v58  ;;  %v1156_v4 = vadd.f32 %v2784_v1, %v3576_v0 }
 0x1d4   : > { %v1147_v5 = vpop.f32.mrf.mxu1 }
 0x1d5   : > { %v1394_v6 = vpack.c.bf16 %v1339_v33, %v1338_v2  ;;  %v1148_v43 = vadd.f32 %v3576_v0, %v1147_v5  ;;  %v1344_v23 = vmax.f32 %v1156_v4, 0.0 }
 0x1d6   : > { %v2785_v8 = vpop.f32.mrf.mxu1 }
 0x1d7   : > { %v1159_v35 = vadd.f32 %v2785_v8, %v3576_v0  ;;  %2858 = vmatprep.mubr.bf16.mxu0 %v1394_v6  ;;  %v1342_v9 = vmax.f32 %v1148_v43, 0.0 }
 0x1d8   : > { %v1150_v10 = vpop.f32.mrf.mxu1  ;;  %2859 = vmatmul.mubr.bf16.gmra.mxu0 %v1395_v56 }
 0x1d9   : > { %v1151_v63 = vadd.f32 %v3576_v0, %v1150_v10  ;;  %v1345_v44 = vmax.f32 %v1159_v35, 0.0 }
 0x1da   : > { %v2788_v13 = vpop.f32.mrf.mxu1 }
 0x1db   : > { %v1343_v60 = vmax.f32 %v1151_v63, 0.0  ;;  %v1397_v19 = vpack.c.bf16 %v1345_v44, %v1344_v23  ;;  %v1172_v47 = vadd.f32 %v2788_v13, %v3576_v0 }
 0x1dc   : > { %v1163_v15 = vpop.f32.mrf.mxu1 }
 0x1dd   : > { %v1396_v17 = vpack.c.bf16 %v1343_v60, %v1342_v9  ;;  %v1164_v24 = vadd.f32 %v3576_v0, %v1163_v15  ;;  %v1348_v22 = vmax.f32 %v1172_v47, 0.0 }
 0x1de   : > { %v2789_v21 = vpop.f32.mrf.mxu1 }
 0x1df   : > { %v1175_v25 = vadd.f32 %v2789_v21, %v3576_v0  ;;  %2862 = vmatprep.mubr.bf16.mxu0 %v1396_v17  ;;  %v1346_v37 = vmax.f32 %v1164_v24, 0.0 }
 0x1e0   : > { %v1166_v11 = vpop.f32.mrf.mxu1  ;;  %2863 = vmatmul.mubr.bf16.gmra.mxu0 %v1397_v19 }
 0x1e1   : > { %v1167_v14 = vadd.f32 %v3576_v0, %v1166_v11  ;;  %v1349_v26 = vmax.f32 %v1175_v25, 0.0 }
 0x1e2   : > { %v2792_v27 = vpop.f32.mrf.mxu1 }
 0x1e3   : > { %v1347_v28 = vmax.f32 %v1167_v14, 0.0  ;;  %v1399_v52 = vpack.c.bf16 %v1349_v26, %v1348_v22  ;;  %v1188_v36 = vadd.f32 %v2792_v27, %v3576_v0 }
 0x1e4   : > { %v1179_v29 = vpop.f32.mrf.mxu1 }
 0x1e5   : > { %v1398_v46 = vpack.c.bf16 %v1347_v28, %v1346_v37  ;;  %v1180_v32 = vadd.f32 %v3576_v0, %v1179_v29  ;;  %v1352_v50 = vmax.f32 %v1188_v36, 0.0 }
 0x1e6   : > { %v2793_v31 = vpop.f32.mrf.mxu1 }
 0x1e7   : > { %v1191_v34 = vadd.f32 %v2793_v31, %v3576_v0  ;;  %2866 = vmatprep.mubr.bf16.mxu0 %v1398_v46  ;;  %v1350_v42 = vmax.f32 %v1180_v32, 0.0 }
 0x1e8   : > { %v1182_v38 = vpop.f32.mrf.mxu1  ;;  %2867 = vmatmul.mubr.bf16.gmra.mxu0 %v1399_v52 }
 0x1e9   : > { %v1183_v39 = vadd.f32 %v3576_v0, %v1182_v38  ;;  %v1353_v40 = vmax.f32 %v1191_v34, 0.0 }
 0x1ea   : > { %v2796_v41 = vpop.f32.mrf.mxu1 }
 0x1eb   : > { %v1351_v45 = vmax.f32 %v1183_v39, 0.0  ;;  %v1401_v3 = vpack.c.bf16 %v1353_v40, %v1352_v50  ;;  %v1204_v51 = vadd.f32 %v2796_v41, %v3576_v0 }
 0x1ec   : > { %v1195_v12 = vpop.f32.mrf.mxu1 }
 0x1ed   : > { %v1400_v48 = vpack.c.bf16 %v1351_v45, %v1350_v42  ;;  %v1196_v49 = vadd.f32 %v3576_v0, %v1195_v12  ;;  %v1356_v30 = vmax.f32 %v1204_v51, 0.0 }
 0x1ee   : > { %v2797_v18 = vpop.f32.mrf.mxu1 }
 0x1ef   : > { %v1207_v7 = vadd.f32 %v2797_v18, %v3576_v0  ;;  %2870 = vmatprep.mubr.bf16.mxu0 %v1400_v48  ;;  %v1354_v16 = vmax.f32 %v1196_v49, 0.0 }
 0x1f0   : > { %v1198_v53 = vpop.f32.mrf.mxu1  ;;  %2871 = vmatmul.mubr.bf16.gmra.mxu0 %v1401_v3 }
 0x1f1   : > { %v1199_v20 = vadd.f32 %v3576_v0, %v1198_v53  ;;  %v1357_v54 = vmax.f32 %v1207_v7, 0.0 }
 0x1f2   : > { %v2800_v55 = vpop.f32.mrf.mxu1 }
 0x1f3   : > { %v1355_v57 = vmax.f32 %v1199_v20, 0.0  ;;  %v1403_v62 = vpack.c.bf16 %v1357_v54, %v1356_v30  ;;  %v1220_v58 = vadd.f32 %v2800_v55, %v3576_v0 }
 0x1f4   : > { %v1211_v59 = vpop.f32.mrf.mxu1 }
 0x1f5   : > { %v1402_v61 = vpack.c.bf16 %v1355_v57, %v1354_v16  ;;  %v1212_v2 = vadd.f32 %v3576_v0, %v1211_v59  ;;  %v1360_v4 = vmax.f32 %v1220_v58, 0.0 }
 0x1f6   : > { %v2801_v1 = vpop.f32.mrf.mxu1 }
 0x1f7   : > { %v1223_v33 = vadd.f32 %v2801_v1, %v3576_v0  ;;  %2874 = vmatprep.mubr.bf16.mxu0 %v1402_v61  ;;  %v1358_v43 = vmax.f32 %v1212_v2, 0.0 }
 0x1f8   : > { %v1214_v5 = vpop.f32.mrf.mxu1  ;;  %2875 = vmatmul.mubr.bf16.gmra.mxu0 %v1403_v62 }
 0x1f9   : > { %v1215_v6 = vadd.f32 %v3576_v0, %v1214_v5  ;;  %v1361_v56 = vmax.f32 %v1223_v33, 0.0 }
 0x1fa   : > { %v2804_v8 = vpop.f32.mrf.mxu1 }
 0x1fb   : > { %v1359_v35 = vmax.f32 %v1215_v6, 0.0  ;;  %v1405_v44 = vpack.c.bf16 %v1361_v56, %v1360_v4  ;;  %v1236_v23 = vadd.f32 %v2804_v8, %v3576_v0 }
 0x1fc   : > { %v1227_v10 = vpop.f32.mrf.mxu1 }
 0x1fd   : > { %v1404_v63 = vpack.c.bf16 %v1359_v35, %v1358_v43  ;;  %v1228_v9 = vadd.f32 %v3576_v0, %v1227_v10  ;;  %v1364_v47 = vmax.f32 %v1236_v23, 0.0 }
 0x1fe   : > { %v2805_v13 = vpop.f32.mrf.mxu1 }
 0x1ff   : > { %v1239_v60 = vadd.f32 %v2805_v13, %v3576_v0  ;;  %2878 = vmatprep.mubr.bf16.mxu0 %v1404_v63  ;;  %v1362_v24 = vmax.f32 %v1228_v9, 0.0 }
 0x200   : > { %v1230_v15 = vpop.f32.mrf.mxu1  ;;  %2879 = vmatmul.mubr.bf16.gmra.mxu0 %v1405_v44 }
 0x201   : > { %v1231_v17 = vadd.f32 %v3576_v0, %v1230_v15  ;;  %v1365_v19 = vmax.f32 %v1239_v60, 0.0 }
 0x202   : > { %v2808_v21 = vpop.f32.mrf.mxu1 }
 0x203   : > { %v1363_v25 = vmax.f32 %v1231_v17, 0.0  ;;  %v1407_v26 = vpack.c.bf16 %v1365_v19, %v1364_v47  ;;  %v1252_v22 = vadd.f32 %v2808_v21, %v3576_v0 }
 0x204   : > { %v1243_v11 = vpop.f32.mrf.mxu1 }
 0x205   : > { %v1406_v14 = vpack.c.bf16 %v1363_v25, %v1362_v24  ;;  %v1244_v37 = vadd.f32 %v3576_v0, %v1243_v11  ;;  %v1368_v36 = vmax.f32 %v1252_v22, 0.0 }
 0x206   : > { %v2809_v27 = vpop.f32.mrf.mxu1 }
 0x207   : > { %v1255_v28 = vadd.f32 %v2809_v27, %v3576_v0  ;;  %2882 = vmatprep.mubr.bf16.mxu0 %v1406_v14  ;;  %v1366_v32 = vmax.f32 %v1244_v37, 0.0 }
 0x208   : > { %v1246_v29 = vpop.f32.mrf.mxu1  ;;  %2883 = vmatmul.mubr.bf16.gmra.mxu0 %v1407_v26 }
 0x209   : > { %v1247_v46 = vadd.f32 %v3576_v0, %v1246_v29  ;;  %v1369_v52 = vmax.f32 %v1255_v28, 0.0 }
 0x20a   : > { %v2812_v31 = vpop.f32.mrf.mxu1 }
 0x20b   : > { %v1367_v34 = vmax.f32 %v1247_v46, 0.0  ;;  %v1409_v40 = vpack.c.bf16 %v1369_v52, %v1368_v36  ;;  %v1268_v50 = vadd.f32 %v2812_v31, %v3576_v0  ;;  %v1978_v46 = vpop.permute.xlu1 %1977  ;;  %v1972_v52 = vpop.permute.xlu0 %1971 }
 0x20c   : > { %v1259_v38 = vpop.f32.mrf.mxu1  ;;  %vm2164_vm3 = vcmp.eq.s32.totalorder %v1978_v46, 1  ;;  %vm2162_vm4 = vcmp.eq.s32.totalorder %v1972_v52, 1 }
 0x20d   : > { %v1408_v39 = vpack.c.bf16 %v1367_v34, %v1366_v32  ;;  %v1260_v42 = vadd.f32 %v3576_v0, %v1259_v38  ;;  %v1372_v51 = vmax.f32 %v1268_v50, 0.0 }
 0x20e   : > { %v2813_v41 = vpop.f32.mrf.mxu1 }
 0x20f   : > { %v1271_v45 = vadd.f32 %v2813_v41, %v3576_v0  ;;  %2886 = vmatprep.mubr.bf16.mxu0 %v1408_v39  ;;  %v1370_v49 = vmax.f32 %v1260_v42, 0.0  ;;  %v1981_v31 = vpop.permute.xlu1 %1980  ;;  %v1975_v32 = vpop.permute.xlu0 %1974 }
 0x210   : > { %v1262_v12 = vpop.f32.mrf.mxu1  ;;  %2887 = vmatmul.mubr.bf16.gmra.mxu0 %v1409_v40  ;;  %vm2165_vm5 = vcmp.eq.s32.totalorder %v1981_v31, 1  ;;  %vm2163_vm9 = vcmp.eq.s32.totalorder %v1975_v32, 1 }
 0x211   : > { %v1263_v48 = vadd.f32 %v3576_v0, %v1262_v12  ;;  %v1373_v3 = vmax.f32 %v1271_v45, 0.0 }
 0x212   : > { %v2816_v18 = vpop.f32.mrf.mxu1 }
 0x213   : > { %v1371_v7 = vmax.f32 %v1263_v48, 0.0  ;;  %v1411_v54 = vpack.c.bf16 %v1373_v3, %v1372_v51  ;;  %v1284_v30 = vadd.f32 %v2816_v18, %v3576_v0  ;;  %v1987_v34 = vpop.permute.xlu1 %1986  ;;  %v1984_v36 = vpop.permute.xlu0 %1983 }
 0x214   : > { %v1275_v53 = vpop.f32.mrf.mxu1  ;;  %vm2166_vm6 = vcmp.eq.s32.totalorder %v1984_v36, 1  ;;  %vm2167_vm10 = vcmp.eq.s32.totalorder %v1987_v34, 1 }
 0x215   : > { %v1410_v20 = vpack.c.bf16 %v1371_v7, %v1370_v49  ;;  %v1276_v16 = vadd.f32 %v3576_v0, %v1275_v53  ;;  %v1376_v58 = vmax.f32 %v1284_v30, 0.0 }
 0x216   : > { %v2817_v55 = vpop.f32.mrf.mxu1 }
 0x217   : > { %v1287_v57 = vadd.f32 %v2817_v55, %v3576_v0  ;;  %2890 = vmatprep.mubr.bf16.mxu0 %v1410_v20  ;;  %v1374_v2 = vmax.f32 %v1276_v16, 0.0  ;;  %v1993_v38 = vpop.permute.xlu1 %1992  ;;  %v1990_v39 = vpop.permute.xlu0 %1989 }
 0x218   : > { %v1278_v59 = vpop.f32.mrf.mxu1  ;;  %2891 = vmatmul.mubr.bf16.gmra.mxu0 %v1411_v54  ;;  %vm2169_vm7 = vcmp.eq.s32.totalorder %v1993_v38, 1  ;;  %vm2168_vm8 = vcmp.eq.s32.totalorder %v1990_v39, 1 }
 0x219   : > { %v1279_v61 = vadd.f32 %v3576_v0, %v1278_v59  ;;  %v1377_v62 = vmax.f32 %v1287_v57, 0.0 }
 0x21a   : > { %v2820_v1 = vpop.f32.mrf.mxu1 }
 0x21b   : > { %v1375_v33 = vmax.f32 %v1279_v61, 0.0  ;;  %v1413_v56 = vpack.c.bf16 %v1377_v62, %v1376_v58  ;;  %v1300_v4 = vadd.f32 %v2820_v1, %v3576_v0  ;;  %v3642_v40 = vpop.permute.xlu1 %1998  ;;  %v3644_v41 = vpop.permute.xlu0 %1995  ;;  %v3681_v1 = vld [vmem:[%s3960_s7] ss:$0 sm:$0xff] }
 0x21c   : > { %v1291_v5 = vpop.f32.mrf.mxu1  ;;  %vm2171_vm11 = vcmp.eq.s32.totalorder %v3642_v40, 1  ;;  %vm2170_vm12 = vcmp.eq.s32.totalorder %v3644_v41, 1 }
 0x21d   : > { %v1412_v6 = vpack.c.bf16 %v1375_v33, %v1374_v2  ;;  %v1292_v43 = vadd.f32 %v3576_v0, %v1291_v5  ;;  %v1380_v23 = vmax.f32 %v1300_v4, 0.0 }
 0x21e   : > { %v2821_v8 = vpop.f32.mrf.mxu1 }
 0x21f   : > { %v1303_v35 = vadd.f32 %v2821_v8, %v3576_v0  ;;  %2894 = vmatprep.mubr.bf16.mxu0 %v1412_v6  ;;  %v1378_v9 = vmax.f32 %v1292_v43, 0.0  ;;  %v3648_v42 = vpop.permute.xlu0 %2001 }
 0x220   : > { %v1294_v10 = vpop.f32.mrf.mxu1  ;;  %2895 = vmatmul.mubr.bf16.gmra.mxu0 %v1413_v56  ;;  %vm2172_vm14 = vcmp.eq.s32.totalorder %v3648_v42, 1 }
 0x221   : > { %v1295_v63 = vadd.f32 %v3576_v0, %v1294_v10  ;;  %v1381_v44 = vmax.f32 %v1303_v35, 0.0 }
 0x222   : > { %v2824_v13 = vpop.f32.mrf.mxu1 }
 0x223   : > { %v1379_v60 = vmax.f32 %v1295_v63, 0.0  ;;  %v1415_v19 = vpack.c.bf16 %v1381_v44, %v1380_v23  ;;  %v1316_v47 = vadd.f32 %v2824_v13, %v3576_v0  ;;  %v3652_v50 = vpop.permute.xlu0 %2007 }
 0x224   : > { %v1307_v15 = vpop.f32.mrf.mxu1  ;;  %vm2174_vm15 = vcmp.eq.s32.totalorder %v3652_v50, 1 }
 0x225   : > { %v1414_v17 = vpack.c.bf16 %v1379_v60, %v1378_v9  ;;  %v1308_v24 = vadd.f32 %v3576_v0, %v1307_v15  ;;  %v1384_v28 = vmax.f32 %v1316_v47, 0.0 }
 0x226   : > { %v2825_v21 = vpop.f32.mrf.mxu1 }
 0x227   : > { %v1319_v25 = vadd.f32 %v2825_v21, %v3576_v0  ;;  %2898 = vmatprep.mubr.bf16.mxu0 %v1414_v17  ;;  %v1382_v27 = vmax.f32 %v1308_v24, 0.0  ;;  %v3656_v48 = vpop.permute.xlu0 %2013 }
 0x228   : > { %v1310_v11 = vpop.f32.mrf.mxu1  ;;  %2899 = vmatmul.mubr.bf16.gmra.mxu0 %v1415_v19  ;;  %vm2176_vm1 = vcmp.eq.s32.totalorder %v3656_v48, 1 }
 0x229   : > { %v1311_v14 = vadd.f32 %v3576_v0, %v1310_v11  ;;  %v1385_v26 = vmax.f32 %v1319_v25, 0.0  ;;  %v3646_v0 = vpop.permute.xlu1 %2004 }
 0x22a   : > { %vm2173_vm13 = vcmp.eq.s32.totalorder %v3646_v0, 1 }
 0x22b   : > { %v1383_v37 = vmax.f32 %v1311_v14, 0.0  ;;  %v1417_v29 = vpack.c.bf16 %v1385_v26, %v1384_v28  ;;  %v3660_v18 = vpop.permute.xlu0 %2019 }
 0x22d   : > { %v1416_v22 = vpack.c.bf16 %v1383_v37, %v1382_v27  ;;  %v3650_v45 = vpop.permute.xlu1 %2010 }
 0x22e   : > { %vm2175_vm2 = vcmp.eq.s32.totalorder %v3650_v45, 1 }
 0x22f   : > { %2902 = vmatprep.mubr.bf16.mxu0 %v1416_v22  ;;  %v3664_v7 = vpop.permute.xlu0 %2025 }
 0x230   : > { %2903 = vmatmul.mubr.bf16.gmra.mxu0 %v1417_v29 }
 0x231   : > { %v3654_v12 = vpop.permute.xlu1 %2016 }
 0x232   : > { %vm2177_vm0 = vcmp.eq.s32.totalorder %v3654_v12, 1 }
 0x233   : > { %v3668_v53 = vpop.permute.xlu0 %2031 }
 0x235   : > { %v3658_v3 = vpop.permute.xlu1 %2022 }
 0x237   : > { %v3672_v16 = vpop.permute.xlu0 %2037 }
 0x239   : > { %v3662_v49 = vpop.permute.xlu1 %2028 }
 0x23b   : > { %v3676_v62 = vpop.permute.xlu0 %2043 }
 0x23d   : > { %v3666_v51 = vpop.permute.xlu1 %2034 }
 0x23f   : > { %v3692_v44 = vpop.permute.xlu0 %2049 }
 0x241   : > { %v3670_v55 = vpop.permute.xlu1 %2040 }
 0x243   : > { %v3699_v29 = vpop.permute.xlu0 %2055 }
 0x245   : > { %v3674_v61 = vpop.permute.xlu1 %2046 }
 0x249   : > { %v3690_v63 = vpop.permute.xlu1 %2052 }
 0x24d   : > { %v3697_v22 = vpop.permute.xlu1 %2058 }
 0x251   : > { %v3704_v39 = vpop.permute.xlu1 %2064 }
 0x278   : > { %v2844_v20 = vpop.f32.mrf.mxu0 }
 0x279   : > { %v1532_v6 = vadd.f32 %v2844_v20, %v3681_v1  ;;  %v3706_v20 = vpop.permute.xlu0 %2061 }
 0x27a   : > { %v1523_v54 = vpop.f32.mrf.mxu0 }
 0x27b   : > { %v1524_v8 = vadd.f32 %v3681_v1, %v1523_v54  ;;  %v2228_v15 = vsel %vm2164_vm3, %v1532_v6, -1e+30 }
 0x27c   : > { %v2845_v57 = vpop.f32.mrf.mxu0 }
 0x27d   : > { %v1535_v2 = vadd.f32 %v2845_v57, %v3681_v1  ;;  %v2226_v21 = vsel %vm2162_vm4, %v1524_v8, -1e+30  ;;  %v3728_v48 = vpop.permute.xlu0 %2067  ;;  %vm2179_vm4 = vcmp.eq.s32.totalorder %v3658_v3, 1 }
 0x27e   : > { %v1526_v30 = vpop.f32.mrf.mxu0 }
 0x27f   : > { %v1527_v43 = vadd.f32 %v3681_v1, %v1526_v30  ;;  %v2229_v4 = vsel %vm2165_vm5, %v1535_v2, -1e+30  ;;  %vm2178_vm5 = vcmp.eq.s32.totalorder %v3660_v18, 1 }
 0x280   : > { %v2848_v59 = vpop.f32.mrf.mxu0 }
 0x281   : > { %v1548_v58 = vadd.f32 %v2848_v59, %v3681_v1  ;;  %v2227_v24 = vsel %vm2163_vm9, %v1527_v43, -1e+30  ;;  %v3739_v40 = vpop.permute.xlu0 %2073  ;;  %vm2185_vm9 = vcmp.eq.s32.totalorder %v3670_v55, 1 }
 0x282   : > { %v1539_v33 = vpop.f32.mrf.mxu0 }
 0x283   : > { %v1540_v5 = vadd.f32 %v3681_v1, %v1539_v33  ;;  %v2232_v13 = vsel %vm2168_vm8, %v1548_v58, -1e+30  ;;  %vm2182_vm8 = vcmp.eq.s32.totalorder %v3668_v53, 1 }
 0x284   : > { %v2849_v56 = vpop.f32.mrf.mxu0  ;;  %v2292_v47 = vmax.f32 %v2228_v15, %v2232_v13 }
 0x285   : > { %v1551_v35 = vadd.f32 %v2849_v56, %v3681_v1  ;;  %v2230_v9 = vsel %vm2166_vm6, %v1540_v5, -1e+30  ;;  %vm2181_vm6 = vcmp.eq.s32.totalorder %v3662_v49, 1 }
 0x286   : > { %v1542_v10 = vpop.f32.mrf.mxu0  ;;  %v2290_v11 = vmax.f32 %v2226_v21, %v2230_v9  ;;  %v3726_v9 = vpop.permute.xlu1 %2070 }
 0x287   : > { %v2233_v60 = vsel %vm2169_vm7, %v1551_v35, -1e+30  ;;  %v1543_v23 = vadd.f32 %v3681_v1, %v1542_v10  ;;  %vm2180_vm7 = vcmp.eq.s32.totalorder %v3664_v7, 1 }
 0x288   : > { %v2293_v17 = vmax.f32 %v2229_v4, %v2233_v60  ;;  %v2852_v19 = vpop.f32.mrf.mxu0 }
 0x289   : > { %v2231_v25 = vsel %vm2167_vm10, %v1543_v23, -1e+30  ;;  %v1564_v59 = vadd.f32 %v2852_v19, %v3681_v1  ;;  %vm2184_vm10 = vcmp.eq.s32.totalorder %v3672_v16, 1 }
 0x28a   : > { %v2291_v14 = vmax.f32 %v2227_v24, %v2231_v25  ;;  %v1555_v26 = vpop.f32.mrf.mxu0  ;;  %v2295_v27 = vmax.f32 %v2292_v47, %v2293_v17 }
 0x28b   : > { %v1556_v33 = vadd.f32 %v3681_v1, %v1555_v26  ;;  %v2236_v10 = vsel %vm2172_vm14, %v1564_v59, -1e+30  ;;  %v3737_v26 = vpop.permute.xlu1 %2076  ;;  %vm2186_vm14 = vcmp.eq.s32.totalorder %v3676_v62, 1 }
 0x28c   : > { %v2294_v37 = vmax.f32 %v2290_v11, %v2291_v14  ;;  %v2853_v28 = vpop.f32.mrf.mxu0 }
 0x28d   : > { %v1567_v36 = vadd.f32 %v2853_v28, %v3681_v1  ;;  %v2234_v60 = vsel %vm2170_vm12, %v1556_v33, -1e+30 }
 0x28e   : > { %v2296_v31 = vmax.f32 %v2294_v37, %v2295_v27  ;;  %v1558_v46 = vpop.f32.mrf.mxu0 }
 0x28f   : > { %v1559_v58 = vadd.f32 %v3681_v1, %v1558_v46  ;;  %v2237_v6 = vsel %vm2173_vm13, %v1567_v36, -1e+30  ;;  %vm2187_vm13 = vcmp.eq.s32.totalorder %v3674_v61, 1 }
 0x290   : > { %v2297_v32 = vrot.slane %v2296_v31, 4  ;;  %v2856_v34 = vpop.f32.mrf.mxu0 }
 0x291   : > { %v1580_v54 = vadd.f32 %v2856_v34, %v3681_v1  ;;  %v2235_v23 = vsel %vm2171_vm11, %v1559_v58, -1e+30  ;;  %vm2183_vm11 = vcmp.eq.s32.totalorder %v3666_v51, 1 }
 0x292   : > { %v2298_v52 = vmax.f32 %v2296_v31, %v2297_v32  ;;  %v1571_v38 = vpop.f32.mrf.mxu0 }
 0x293   : > { %v1572_v57 = vadd.f32 %v3681_v1, %v1571_v38  ;;  %v2240_v8 = vsel %vm2176_vm1, %v1580_v54, -1e+30  ;;  %v3750_v54 = vpop.permute.xlu1 %2082  ;;  %vm2190_vm1 = vcmp.eq.s32.totalorder %v3699_v29, 1 }
 0x294   : > { %v2299_v30 = vrot.slane %v2298_v52, 2  ;;  %v2857_v2 = vpop.f32.mrf.mxu0  ;;  %v2308_v17 = vmax.f32 %v2236_v10, %v2240_v8 }
 0x295   : > { %v1583_v5 = vadd.f32 %v2857_v2, %v3681_v1  ;;  %v2238_v43 = vsel %vm2174_vm15, %v1572_v57, -1e+30  ;;  %v3752_v57 = vpop.permute.xlu0 %2079  ;;  %vm2189_vm15 = vcmp.eq.s32.totalorder %v3690_v63, 1 }
 0x296   : > { %v2300_v0 = vmax.f32 %v2298_v52, %v2299_v30  ;;  %v1574_v56 = vpop.f32.mrf.mxu0  ;;  %v2306_v19 = vmax.f32 %v2234_v60, %v2238_v43 }
 0x297   : > { %v2241_v35 = vsel %vm2177_vm0, %v1583_v5, -1e+30  ;;  %v1575_v4 = vadd.f32 %v3681_v1, %v1574_v56  ;;  %v3767_v51 = vpop.permute.xlu1 %2088  ;;  %vm2188_vm0 = vcmp.eq.s32.totalorder %v3692_v44, 1 }
 0x298   : > { %v2301_v50 = vrot.slane %v2300_v0, 1  ;;  %v2309_v13 = vmax.f32 %v2237_v6, %v2241_v35  ;;  %v2860_v12 = vpop.f32.mrf.mxu0 }
 0x299   : > { %v2239_v15 = vsel %vm2175_vm2, %v1575_v4, -1e+30  ;;  %v1596_v36 = vadd.f32 %v2860_v12, %v3681_v1  ;;  %vm2193_vm2 = vcmp.eq.s32.totalorder %v3704_v39, 1 }
 0x29a   : > { %v2302_v45 = vmax.f32 %v2300_v0, %v2301_v50  ;;  %v2307_v21 = vmax.f32 %v2235_v23, %v2239_v15  ;;  %v1587_v24 = vpop.f32.mrf.mxu0  ;;  %v2311_v42 = vmax.f32 %v2308_v17, %v2309_v13  ;;  %v3769_v23 = vpop.permute.xlu0 %2085 }
 0x29b   : > { %v1588_v30 = vadd.f32 %v3681_v1, %v1587_v24  ;;  %v2244_v8 = vsel %vm2180_vm7, %v1596_v36, -1e+30  ;;  %v3772_v24 = vpop.permute.xlu1 %2094  ;;  %vm2194_vm7 = vcmp.eq.s32.totalorder %v3728_v48, 1 }
 0x29c   : > { %vm2303_vm3 = vcmp.gt.f32.partialorder %v2302_v45, -1e+29  ;;  %v2310_v25 = vmax.f32 %v2306_v19, %v2307_v21  ;;  %v2861_v47 = vpop.f32.mrf.mxu0 }
 0x29d   : > { %v2304_v11 = vsel %vm2303_vm3, %v2302_v45, 0.0  ;;  %v1599_v31 = vadd.f32 %v2861_v47, %v3681_v1  ;;  %v2242_v55 = vsel %vm2178_vm5, %v1588_v30, -1e+30  ;;  %vm2192_vm3 = vcmp.eq.s32.totalorder %v3706_v20, 1 }
 0x29e   : > { %2305 = vst [vmem:[%s3734_s18] sm:$0x1] %v2304_v11  ;;  %v2312_v41 = vmax.f32 %v2310_v25, %v2311_v42  ;;  %v1590_v14 = vpop.f32.mrf.mxu0  ;;  %v3774_v42 = vpop.permute.xlu0 %2091 }
 0x29f   : > { %v1591_v59 = vadd.f32 %v3681_v1, %v1590_v14  ;;  %v2245_v33 = vsel %vm2181_vm6, %v1599_v31, -1e+30  ;;  %v3790_v36 = vpop.permute.xlu1 %2100  ;;  %vm2195_vm6 = vcmp.eq.s32.totalorder %v3726_v9, 1 }
 0x2a0   : > { %v2313_v27 = vrot.slane %v2312_v41, 4  ;;  %v2864_v37 = vpop.f32.mrf.mxu0 }
 0x2a1   : > { %v1612_v32 = vadd.f32 %v2864_v37, %v3681_v1  ;;  %v2243_v16 = vsel %vm2179_vm4, %v1591_v59, -1e+30  ;;  %vm2191_vm4 = vcmp.eq.s32.totalorder %v3697_v22, 1 }
 0x2a2   : > { %v2314_v28 = vmax.f32 %v2312_v41, %v2313_v27  ;;  %v1603_v46 = vpop.f32.mrf.mxu0 }
 0x2a3   : > { %v1604_v34 = vadd.f32 %v3681_v1, %v1603_v46  ;;  %v2248_v5 = vsel %vm2184_vm10, %v1612_v32, -1e+30  ;;  %vm2198_vm10 = vcmp.eq.s32.totalorder %v3752_v57, 1 }
 0x2a4   : > { %v2315_v52 = vrot.slane %v2314_v28, 2  ;;  %v2865_v38 = vpop.f32.mrf.mxu0  ;;  %v2324_v10 = vmax.f32 %v2244_v8, %v2248_v5 }
 0x2a5   : > { %v1615_v2 = vadd.f32 %v2865_v38, %v3681_v1  ;;  %v2246_v0 = vsel %vm2182_vm8, %v1604_v34, -1e+30  ;;  %v3792_v38 = vpop.permute.xlu0 %2097  ;;  %vm2197_vm8 = vcmp.eq.s32.totalorder %v3737_v26, 1 }
 0x2a6   : > { %v2316_v49 = vmax.f32 %v2314_v28, %v2315_v52  ;;  %v1606_v58 = vpop.f32.mrf.mxu0  ;;  %v2322_v13 = vmax.f32 %v2242_v55, %v2246_v0  ;;  %v3802_v55 = vpop.permute.xlu1 %2106 }
 0x2a7   : > { %v2249_v53 = vsel %vm2185_vm9, %v1615_v2, -1e+30  ;;  %v1607_v6 = vadd.f32 %v3681_v1, %v1606_v58  ;;  %vm2196_vm9 = vcmp.eq.s32.totalorder %v3739_v40, 1 }
 0x2a8   : > { %v2317_v56 = vrot.slane %v2316_v49, 1  ;;  %v2325_v43 = vmax.f32 %v2245_v33, %v2249_v53  ;;  %v2868_v35 = vpop.f32.mrf.mxu0 }
 0x2a9   : > { %v2247_v4 = vsel %vm2183_vm11, %v1607_v6, -1e+30  ;;  %v1628_v37 = vadd.f32 %v2868_v35, %v3681_v1  ;;  %vm2201_vm11 = vcmp.eq.s32.totalorder %v3767_v51, 1 }
 0x2aa   : > { %v2318_v50 = vmax.f32 %v2316_v49, %v2317_v56  ;;  %v2323_v12 = vmax.f32 %v2243_v16, %v2247_v4  ;;  %v1619_v60 = vpop.f32.mrf.mxu0  ;;  %v2327_v7 = vmax.f32 %v2324_v10, %v2325_v43  ;;  %v3804_v16 = vpop.permute.xlu0 %2103 }
 0x2ab   : > { %v1620_v31 = vadd.f32 %v3681_v1, %v1619_v60  ;;  %v2252_v39 = vsel %vm2188_vm0, %v1628_v37, -1e+30  ;;  %vm2202_vm0 = vcmp.eq.s32.totalorder %v3774_v42, 1 }
 0x2ac   : > { %vm2319_vm12 = vcmp.gt.f32.partialorder %v2318_v50, -1e+29  ;;  %v2326_v15 = vmax.f32 %v2322_v13, %v2323_v12  ;;  %v2869_v45 = vpop.f32.mrf.mxu0 }
 0x2ad   : > { %v2320_v18 = vsel %vm2319_vm12, %v2318_v50, 0.0  ;;  %v1631_v47 = vadd.f32 %v2869_v45, %v3681_v1  ;;  %v2250_v58 = vsel %vm2186_vm14, %v1620_v31, -1e+30  ;;  %vm2200_vm12 = vcmp.eq.s32.totalorder %v3769_v23, 1 }
 0x2ae   : > { %2321 = vst [vmem:[%s3734_s18 + $0x1] sm:$0x1] %v2320_v18  ;;  %v2328_v17 = vmax.f32 %v2326_v15, %v2327_v7  ;;  %v1622_v19 = vpop.f32.mrf.mxu0  ;;  %v3810_v7 = vpop.permute.xlu1 %2112 }
 0x2af   : > { %v1623_v46 = vadd.f32 %v3681_v1, %v1622_v19  ;;  %v2253_v63 = vsel %vm2189_vm15, %v1631_v47, -1e+30  ;;  %v3812_v15 = vpop.permute.xlu0 %2109  ;;  %vm2203_vm15 = vcmp.eq.s32.totalorder %v3772_v24, 1 }
 0x2b0   : > { %v2329_v3 = vrot.slane %v2328_v17, 4  ;;  %v2872_v21 = vpop.f32.mrf.mxu0 }
 0x2b1   : > { %v1644_v41 = vadd.f32 %v2872_v21, %v3681_v1  ;;  %v2251_v5 = vsel %vm2187_vm13, %v1623_v46, -1e+30  ;;  %vm2199_vm13 = vcmp.eq.s32.totalorder %v3750_v54, 1 }
 0x2b2   : > { %v2330_v25 = vmax.f32 %v2328_v17, %v2329_v3  ;;  %v1635_v11 = vpop.f32.mrf.mxu0  ;;  %v3829_v51 = vpop.permute.xlu1 %2118 }
 0x2b3   : > { %v1636_v14 = vadd.f32 %v3681_v1, %v1635_v11  ;;  %v2256_v30 = vsel %vm2192_vm3, %v1644_v41, -1e+30  ;;  %v3831_v23 = vpop.permute.xlu0 %2115  ;;  %vm2206_vm3 = vcmp.eq.s32.totalorder %v3804_v16, 1 }
 0x2b4   : > { %v2331_v27 = vrot.slane %v2330_v25, 2  ;;  %v2873_v28 = vpop.f32.mrf.mxu0  ;;  %v2340_v6 = vmax.f32 %v2252_v39, %v2256_v30 }
 0x2b5   : > { %v1647_v32 = vadd.f32 %v2873_v28, %v3681_v1  ;;  %v2254_v59 = vsel %vm2190_vm1, %v1636_v14, -1e+30  ;;  %vm2205_vm1 = vcmp.eq.s32.totalorder %v3790_v36, 1 }
 0x2b6   : > { %v2332_v34 = vmax.f32 %v2330_v25, %v2331_v27  ;;  %v1638_v52 = vpop.f32.mrf.mxu0  ;;  %v2338_v56 = vmax.f32 %v2250_v58, %v2254_v59 }
 0x2b7   : > { %v2257_v29 = vsel %vm2193_vm2, %v1647_v32, -1e+30  ;;  %v1639_v2 = vadd.f32 %v3681_v1, %v1638_v52  ;;  %v3840_v48 = vpop.permute.xlu0 %2121  ;;  %vm2204_vm2 = vcmp.eq.s32.totalorder %v3792_v38, 1 }
 0x2b8   : > { %v2333_v49 = vrot.slane %v2332_v34, 1  ;;  %v2341_v33 = vmax.f32 %v2253_v63, %v2257_v29  ;;  %v2876_v20 = vpop.f32.mrf.mxu0 }
 0x2b9   : > { %v2255_v0 = vsel %vm2191_vm4, %v1639_v2, -1e+30  ;;  %v1660_v19 = vadd.f32 %v2876_v20, %v3681_v1  ;;  %vm2209_vm4 = vcmp.eq.s32.totalorder %v3810_v7, 1 }
 0x2ba   : > { %v2334_v53 = vmax.f32 %v2332_v34, %v2333_v49  ;;  %v2339_v8 = vmax.f32 %v2251_v5, %v2255_v0  ;;  %v1651_v43 = vpop.f32.mrf.mxu0  ;;  %v2343_v22 = vmax.f32 %v2340_v6, %v2341_v33  ;;  %v3838_v5 = vpop.permute.xlu1 %2124 }
 0x2bb   : > { %v1652_v21 = vadd.f32 %v3681_v1, %v1651_v43  ;;  %v2260_v31 = vsel %vm2196_vm9, %v1660_v19, -1e+30  ;;  %vm2210_vm9 = vcmp.eq.s32.totalorder %v3831_v23, 1 }
 0x2bc   : > { %vm2335_vm5 = vcmp.gt.f32.partialorder %v2334_v53, -1e+29  ;;  %v2342_v35 = vmax.f32 %v2338_v56, %v2339_v8  ;;  %v2877_v44 = vpop.f32.mrf.mxu0 }
 0x2bd   : > { %v2336_v62 = vsel %vm2335_vm5, %v2334_v53, 0.0  ;;  %v1663_v12 = vadd.f32 %v2877_v44, %v3681_v1  ;;  %v2258_v34 = vsel %vm2194_vm7, %v1652_v21, -1e+30  ;;  %vm2208_vm5 = vcmp.eq.s32.totalorder %v3812_v15, 1 }
 0x2be   : > { %2337 = vst [vmem:[%s3734_s18 + $0x2] sm:$0x1] %v2336_v62  ;;  %v2344_v4 = vmax.f32 %v2342_v35, %v2343_v22  ;;  %v1654_v50 = vpop.f32.mrf.mxu0  ;;  %v3851_v62 = vpop.permute.xlu1 %2130 }
 0x2bf   : > { %v1655_v25 = vadd.f32 %v3681_v1, %v1654_v50  ;;  %v2261_v26 = vsel %vm2197_vm8, %v1663_v12, -1e+30  ;;  %vm2211_vm8 = vcmp.eq.s32.totalorder %v3829_v51, 1 }
 0x2c0   : > { %v2345_v61 = vrot.slane %v2344_v4, 4  ;;  %v2880_v10 = vpop.f32.mrf.mxu0 }
 0x2c1   : > { %v1676_v45 = vadd.f32 %v2880_v10, %v3681_v1  ;;  %v2259_v63 = vsel %vm2195_vm6, %v1655_v25, -1e+30  ;;  %vm2207_vm6 = vcmp.eq.s32.totalorder %v3802_v55, 1 }
 0x2c2   : > { %v2346_v13 = vmax.f32 %v2344_v4, %v2345_v61  ;;  %v1667_v60 = vpop.f32.mrf.mxu0  ;;  %v3853_v4 = vpop.permute.xlu0 %2127 }
 0x2c3   : > { %v1668_v18 = vadd.f32 %v3681_v1, %v1667_v60  ;;  %v2264_v14 = vsel %vm2200_vm12, %v1676_v45, -1e+30  ;;  %v2137_v55 = vpop.permute.xlu1 %2136  ;;  %vm2214_vm12 = vcmp.eq.s32.totalorder %v3853_v4, 1 }
 0x2c4   : > { %v2347_v17 = vrot.slane %v2346_v13, 2  ;;  %v2881_v3 = vpop.f32.mrf.mxu0  ;;  %v2356_v54 = vmax.f32 %v2260_v31, %v2264_v14 }
 0x2c5   : > { %v1679_v47 = vadd.f32 %v2881_v3, %v3681_v1  ;;  %v2262_v27 = vsel %vm2198_vm10, %v1668_v18, -1e+30  ;;  %vm2213_vm10 = vcmp.eq.s32.totalorder %v3838_v5, 1 }
 0x2c6   : > { %v2348_v11 = vmax.f32 %v2346_v13, %v2347_v17  ;;  %v1670_v41 = vpop.f32.mrf.mxu0  ;;  %v2354_v59 = vmax.f32 %v2258_v34, %v2262_v27  ;;  %v2134_v27 = vpop.permute.xlu0 %2133 }
 0x2c7   : > { %v2265_v37 = vsel %vm2201_vm11, %v1679_v47, -1e+30  ;;  %v1671_v28 = vadd.f32 %v3681_v1, %v1670_v41  ;;  %v3869_v24 = vpop.permute.xlu1 %2142  ;;  %vm2212_vm11 = vcmp.eq.s32.totalorder %v3840_v48, 1 }
 0x2c8   : > { %v2349_v57 = vrot.slane %v2348_v11, 1  ;;  %v2357_v46 = vmax.f32 %v2261_v26, %v2265_v37  ;;  %v2884_v32 = vpop.f32.mrf.mxu0 }
 0x2c9   : > { %v2263_v52 = vsel %vm2199_vm13, %v1671_v28, -1e+30  ;;  %v1692_v35 = vadd.f32 %v2884_v32, %v3681_v1  ;;  %vm2217_vm13 = vcmp.eq.s32.totalorder %v2137_v55, 1 }
 0x2ca   : > { %v2350_v30 = vmax.f32 %v2348_v11, %v2349_v57  ;;  %v2355_v29 = vmax.f32 %v2259_v63, %v2263_v52  ;;  %v1683_v40 = vpop.f32.mrf.mxu0  ;;  %v2359_v2 = vmax.f32 %v2356_v54, %v2357_v46  ;;  %v3871_v34 = vpop.permute.xlu0 %2139 }
 0x2cb   : > { %v1684_v50 = vadd.f32 %v3681_v1, %v1683_v40  ;;  %v2268_v19 = vsel %vm2204_vm2, %v1692_v35, -1e+30  ;;  %v2149_v5 = vpop.permute.xlu1 %2148  ;;  %vm2218_vm2 = vcmp.eq.s32.totalorder %v3871_v34, 1 }
 0x2cc   : > { %vm2351_vm14 = vcmp.gt.f32.partialorder %v2350_v30, -1e+29  ;;  %v2358_v49 = vmax.f32 %v2354_v59, %v2355_v29  ;;  %v2885_v39 = vpop.f32.mrf.mxu0 }
 0x2cd   : > { %v2352_v33 = vsel %vm2351_vm14, %v2350_v30, 0.0  ;;  %v1695_v6 = vadd.f32 %v2885_v39, %v3681_v1  ;;  %v2266_v7 = vsel %vm2202_vm0, %v1684_v50, -1e+30  ;;  %vm2216_vm14 = vcmp.eq.s32.totalorder %v2134_v27, 1 }
 0x2ce   : > { %2353 = vst [vmem:[%s3734_s18 + $0x3] sm:$0x1] %v2352_v33  ;;  %v2360_v20 = vmax.f32 %v2358_v49, %v2359_v2  ;;  %v1686_v58 = vpop.f32.mrf.mxu0 }
 0x2cf   : > { %v1687_v61 = vadd.f32 %v3681_v1, %v1686_v58  ;;  %v2269_v13 = vsel %vm2205_vm1, %v1695_v6, -1e+30  ;;  %vm2219_vm1 = vcmp.eq.s32.totalorder %v3869_v24, 1 }
 0x2d0   : > { %v2361_v9 = vrot.slane %v2360_v20, 4  ;;  %v2888_v0 = vpop.f32.mrf.mxu0 }
 0x2d1   : > { %v1708_v8 = vadd.f32 %v2888_v0, %v3681_v1  ;;  %v2267_v15 = vsel %vm2203_vm15, %v1687_v61, -1e+30  ;;  %v2146_v0 = vpop.permute.xlu0 %2145  ;;  %vm2215_vm15 = vcmp.eq.s32.totalorder %v3851_v62, 1 }
 0x2d2   : > { %v2362_v53 = vmax.f32 %v2360_v20, %v2361_v9  ;;  %v1699_v56 = vpop.f32.mrf.mxu0 }
 0x2d3   : > { %v1700_v43 = vadd.f32 %v3681_v1, %v1699_v56  ;;  %v2272_v60 = vsel %vm2208_vm5, %v1708_v8, -1e+30 }
 0x2d4   : > { %v2363_v22 = vrot.slane %v2362_v53, 2  ;;  %v2889_v44 = vpop.f32.mrf.mxu0  ;;  %v2372_v11 = vmax.f32 %v2268_v19, %v2272_v60 }
 0x2d5   : > { %v1711_v10 = vadd.f32 %v2889_v44, %v3681_v1  ;;  %v2270_v45 = vsel %vm2206_vm3, %v1700_v43, -1e+30  ;;  %vm2221_vm3 = vcmp.eq.s32.totalorder %v2149_v5, 1 }
 0x2d6   : > { %v2364_v36 = vmax.f32 %v2362_v53, %v2363_v22  ;;  %v1702_v12 = vpop.f32.mrf.mxu0  ;;  %v2370_v26 = vmax.f32 %v2266_v7, %v2270_v45 }
 0x2d7   : > { %v2273_v16 = vsel %vm2209_vm4, %v1711_v10, -1e+30  ;;  %v1703_v18 = vadd.f32 %v3681_v1, %v1702_v12  ;;  %vm2220_vm4 = vcmp.eq.s32.totalorder %v2146_v0, 1 }
 0x2d8   : > { %v2365_v17 = vrot.slane %v2364_v36, 1  ;;  %v2373_v3 = vmax.f32 %v2269_v13, %v2273_v16  ;;  %v2892_v21 = vpop.f32.mrf.mxu0  ;;  %v2155_v16 = vpop.permute.xlu1 %2154 }
 0x2d9   : > { %v2271_v25 = vsel %vm2207_vm6, %v1703_v18, -1e+30  ;;  %v1724_v40 = vadd.f32 %v2892_v21, %v3681_v1  ;;  %v2152_v18 = vpop.permute.xlu0 %2151 }
 0x2da   : > { %v2366_v47 = vmax.f32 %v2364_v36, %v2365_v17  ;;  %v2371_v41 = vmax.f32 %v2267_v15, %v2271_v25  ;;  %v1715_v14 = vpop.f32.mrf.mxu0  ;;  %v2375_v38 = vmax.f32 %v2372_v11, %v2373_v3  ;;  %vm2222_vm5 = vcmp.eq.s32.totalorder %v2152_v18, 1 }
 0x2db   : > { %v1716_v49 = vadd.f32 %v3681_v1, %v1715_v14  ;;  %v2276_v22 = vsel %vm2212_vm11, %v1724_v40, -1e+30 }
 0x2dc   : > { %vm2367_vm7 = vcmp.gt.f32.partialorder %v2366_v47, -1e+29  ;;  %v2374_v37 = vmax.f32 %v2370_v26, %v2371_v41  ;;  %v2893_v28 = vpop.f32.mrf.mxu0  ;;  %v2161_v25 = vpop.permute.xlu1 %2160 }
 0x2dd   : > { %v2368_v57 = vsel %vm2367_vm7, %v2366_v47, 0.0  ;;  %v1727_v52 = vadd.f32 %v2893_v28, %v3681_v1  ;;  %v2274_v4 = vsel %vm2210_vm9, %v1716_v49, -1e+30  ;;  %v2158_v47 = vpop.permute.xlu0 %2157  ;;  %vm2225_vm6 = vcmp.eq.s32.totalorder %v2161_v25, 1 }
 0x2de   : > { %2369 = vst [vmem:[%s3734_s18 + $0x4] sm:$0x1] %v2368_v57  ;;  %v2376_v42 = vmax.f32 %v2374_v37, %v2375_v38  ;;  %v1718_v31 = vpop.f32.mrf.mxu0  ;;  %vm2224_vm7 = vcmp.eq.s32.totalorder %v2158_v47, 1 }
 0x2df   : > { %v1719_v39 = vadd.f32 %v3681_v1, %v1718_v31  ;;  %v2277_v58 = vsel %vm2213_vm10, %v1727_v52, -1e+30 }
 0x2e0   : > { %v2377_v46 = vrot.slane %v2376_v42, 4  ;;  %v2896_v32 = vpop.f32.mrf.mxu0 }
 0x2e1   : > { %v1740_v54 = vadd.f32 %v2896_v32, %v3681_v1  ;;  %v2275_v50 = vsel %vm2211_vm8, %v1719_v39, -1e+30  ;;  %vm2223_vm8 = vcmp.eq.s32.totalorder %v2155_v16, 1 }
 0x2e2   : > { %v2378_v63 = vmax.f32 %v2376_v42, %v2377_v46  ;;  %v1731_v30 = vpop.f32.mrf.mxu0 }
 0x2e3   : > { %v1732_v59 = vadd.f32 %v3681_v1, %v1731_v30  ;;  %v2280_v53 = vsel %vm2216_vm14, %v1740_v54, -1e+30 }
 0x2e4   : > { %v2379_v29 = vrot.slane %v2378_v63, 2  ;;  %v2897_v2 = vpop.f32.mrf.mxu0  ;;  %v2388_v36 = vmax.f32 %v2276_v22, %v2280_v53 }
 0x2e5   : > { %v1743_v33 = vadd.f32 %v2897_v2, %v3681_v1  ;;  %v2278_v6 = vsel %vm2214_vm12, %v1732_v59, -1e+30 }
 0x2e6   : > { %v2380_v20 = vmax.f32 %v2378_v63, %v2379_v29  ;;  %v1734_v9 = vpop.f32.mrf.mxu0  ;;  %v2386_v13 = vmax.f32 %v2274_v4, %v2278_v6 }
 0x2e7   : > { %v2281_v56 = vsel %vm2217_vm13, %v1743_v33, -1e+30  ;;  %v1735_v8 = vadd.f32 %v3681_v1, %v1734_v9 }
 0x2e8   : > { %v2381_v43 = vrot.slane %v2380_v20, 1  ;;  %v2389_v35 = vmax.f32 %v2277_v58, %v2281_v56  ;;  %v2900_v44 = vpop.f32.mrf.mxu0 }
 0x2e9   : > { %v2279_v61 = vsel %vm2215_vm15, %v1735_v8, -1e+30  ;;  %v1756_v14 = vadd.f32 %v2900_v44, %v3681_v1 }
 0x2ea   : > { %v2382_v10 = vmax.f32 %v2380_v20, %v2381_v43  ;;  %v2387_v12 = vmax.f32 %v2275_v50, %v2279_v61  ;;  %v1747_v60 = vpop.f32.mrf.mxu0  ;;  %v2391_v62 = vmax.f32 %v2388_v36, %v2389_v35 }
 0x2eb   : > { %v1748_v27 = vadd.f32 %v3681_v1, %v1747_v60  ;;  %v2284_v30 = vsel %vm2220_vm4, %v1756_v14, -1e+30 }
 0x2ec   : > { %vm2383_vm0 = vcmp.gt.f32.partialorder %v2382_v10, -1e+29  ;;  %v2390_v45 = vmax.f32 %v2386_v13, %v2387_v12  ;;  %v2901_v48 = vpop.f32.mrf.mxu0 }
 0x2ed   : > { %v2384_v17 = vsel %vm2383_vm0, %v2382_v10, 0.0  ;;  %v1759_v7 = vadd.f32 %v2901_v48, %v3681_v1  ;;  %v2282_v59 = vsel %vm2218_vm2, %v1748_v27, -1e+30 }
 0x2ee   : > { %2385 = vst [vmem:[%s3734_s18 + $0x5] sm:$0x1] %v2384_v17  ;;  %v2392_v23 = vmax.f32 %v2390_v45, %v2391_v62  ;;  %v1750_v19 = vpop.f32.mrf.mxu0 }
 0x2ef   : > { %v1751_v38 = vadd.f32 %v3681_v1, %v1750_v19  ;;  %v2285_v57 = vsel %vm2221_vm3, %v1759_v7, -1e+30 }
 0x2f0   : > { %v2393_v3 = vrot.slane %v2392_v23, 4  ;;  %v2904_v21 = vpop.f32.mrf.mxu0 }
 0x2f1   : > { %v1772_v11 = vadd.f32 %v2904_v21, %v3681_v1  ;;  %v2283_v29 = vsel %vm2219_vm1, %v1751_v38, -1e+30 }
 0x2f2   : > { %v2394_v51 = vmax.f32 %v2392_v23, %v2393_v3  ;;  %v1763_v15 = vpop.f32.mrf.mxu0 }
 0x2f3   : > { %v1764_v26 = vadd.f32 %v3681_v1, %v1763_v15  ;;  %v2288_v31 = vsel %vm2224_vm7, %v1772_v11, -1e+30 }
 0x2f4   : > { %v2395_v41 = vrot.slane %v2394_v51, 2  ;;  %v2905_v55 = vpop.f32.mrf.mxu0  ;;  %v2404_v49 = vmax.f32 %v2284_v30, %v2288_v31 }
 0x2f5   : > { %v1775_v37 = vadd.f32 %v2905_v55, %v3681_v1  ;;  %v2286_v46 = vsel %vm2222_vm5, %v1764_v26, -1e+30 }
 0x2f6   : > { %v2396_v28 = vmax.f32 %v2394_v51, %v2395_v41  ;;  %v1766_v42 = vpop.f32.mrf.mxu0  ;;  %v2402_v39 = vmax.f32 %v2282_v59, %v2286_v46 }
 0x2f7   : > { %v2289_v32 = vsel %vm2225_vm6, %v1775_v37, -1e+30  ;;  %v1767_v63 = vadd.f32 %v3681_v1, %v1766_v42 }
 0x2f8   : > { %v2397_v52 = vrot.slane %v2396_v28, 1  ;;  %v2405_v54 = vmax.f32 %v2285_v57, %v2289_v32 }
 0x2f9   : > { %v2287_v40 = vsel %vm2223_vm8, %v1767_v63, -1e+30 }
 0x2fa   : > { %v2398_v2 = vmax.f32 %v2396_v28, %v2397_v52  ;;  %v2403_v33 = vmax.f32 %v2283_v29, %v2287_v40  ;;  %v2407_v1 = vmax.f32 %v2404_v49, %v2405_v54 }
 0x2fc   : > { %vm2399_vm9 = vcmp.gt.f32.partialorder %v2398_v2, -1e+29  ;;  %v2406_v20 = vmax.f32 %v2402_v39, %v2403_v33 }
 0x2fd   : > { %v2400_v58 = vsel %vm2399_vm9, %v2398_v2, 0.0 }
 0x2fe   : > { %2401 = vst [vmem:[%s3734_s18 + $0x6] sm:$0x1] %v2400_v58  ;;  %v2408_v9 = vmax.f32 %v2406_v20, %v2407_v1 }
 0x300   : > { %v2409_v34 = vrot.slane %v2408_v9, 4 }
 0x302   : > { %v2410_v5 = vmax.f32 %v2408_v9, %v2409_v34 }
 0x304   : > { %v2411_v24 = vrot.slane %v2410_v5, 2 }
 0x306   : > { %v2412_v0 = vmax.f32 %v2410_v5, %v2411_v24 }
 0x308   : > { %v2413_v53 = vrot.slane %v2412_v0, 1 }
 0x30a   : > { %v2414_v6 = vmax.f32 %v2412_v0, %v2413_v53 }
 0x30c   : > { %vm2415_vm10 = vcmp.gt.f32.partialorder %v2414_v6, -1e+29 }
 0x30d   : > { %v2416_v56 = vsel %vm2415_vm10, %v2414_v6, 0.0 }
 0x30e   : > { %2417 = vst [vmem:[%s3734_s18 + $0x7] sm:$0x1] %v2416_v56 }
 0x30f   : > { %2980 = shalt.err (!%p2977_p3)
}
 0x310   : > { %s2981_s12 = scalar_lea.hbm %s3915_s24, 128  ;;  %s2985_s18 = scalar_lea.hbm %s3961_s8, 512 }
 0x311   : > { %p2982_p4 = scmp.ne.s32.totalorder %s3915_s24, %s2981_s12  ;;  %p2986_p9 = scmp.lt.s32.totalorder %s3915_s24, %s3961_s8 }
 0x312   : > { %p2987_p10 = scmp.lt.s32.totalorder %s2985_s18, %s2981_s12 }
 0x313   : > { %p2983_p7 = pnand %p2982_p4, %p3115_p5 }
 0x314   : > { %p2988_p11 = por %p2987_p10, %p2986_p9 }
 0x315   : > { %p2984_p8 = pneg %p2983_p7 }
 0x317   : > { %p2989_p12 = pnand %p2988_p11, %p2984_p8 }
 0x319   : > { %2992 = shalt.err (!%p2989_p12)
}
 0x31a   : > { %2908 = dma.vmem_to_hbm [thread:$0]  (%p3115_p5), %s2433_s20, 128, %s3915_s24, %s2419_s26  }
 0x31b PF: > { %p2914_p13 = scmp.ge.s32.totalorder %s3027_s30, 2  ;;  %s2444_s23 = sand.u32 1, %s3015_s27  }
 0x31c   : > { %s2445_s19 = scalar_lea.sflag [#allocation3], %s2444_s23 }
 0x31d   : > { %p2911_p0 = pnand %p2914_p13, %p3119_p6 }
 0x31f   : > { %p2912_p1 = pneg %p2911_p0 }
 0x321   : > { %3010 = dma.done.wait (%p2912_p1), %s2445_s19, 128  }
 0x322   : > { %3012 = vsyncadd (%p2912_p1), %s2445_s19, 4294967168  ;;  %p18_p2 = scmp.ge.s32.totalorder %s3102_s11, 6   ;;  %s3964_s27 = smov %s3019_s28 }
 0x323   : > { %s3965_s28 = smov %s3023_s29  ;;  %s3966_s29 = smov %s3113_s14 }
 0x324   : > { %s3967_s30 = smov %s3102_s11  ;;  %20 = sbr.rel (!%p18_p2) target bundleno = 3 (0x3), region = 90 }
 0x329   :  { %2450 = vsyncpa [#allocation3], 1 }
 0x32a   :  { %2452 = vsyncpa [#allocation3 + $0x1], 1 }

</bundles_post_ra>
